<compile_context>
chip_gen: v5e
topology: v5e:2x2
jax: 0.10.0
libtpu: 0.0.40
codegen_flags: <defaults>
</compile_context>

<pallas_src>
import functools

import jax
import jax.numpy as jnp
from jax.experimental import pallas as pl
from jax.experimental.pallas import tpu as pltpu


# ----------------------------- synthetic sizes ------------------------------

BATCH = 2
IMG_C, IMG_H, IMG_W = 3, 16, 16
BG_FEATS, CROP_FEATS = 32, 24          # ._fc.in_features of the two backbones
OUT_FEATURES = 16
OPAD = 128                             # lane-dense padded classifier width
VOCAB, TYPE_VOCAB = 64, 2
SEQ, HIDDEN = 8, 32                    # config.hidden_size
N_HIDDENS = 3
BERT_LAYERS = 4                        # -> len(hidden_states) == BERT_LAYERS + 1

_VMEM_LIMIT = 32 * 1024 * 1024


# ------------------------------- fused kernel -------------------------------

def _group_mean(x2d, rows, count):
    """Mean over consecutive tile-aligned row groups: [count*rows, F] -> [count, F]."""
    inv = 1.0 / rows
    return jnp.concatenate(
        [jnp.sum(x2d[i * rows:(i + 1) * rows, :], axis=0, keepdims=True)
         for i in range(count)], axis=0) * inv


def fused_kernel(bg_ref, cr_ref, wbg_ref, bbg_ref, wcr_ref, bcr_ref,
                 wclsbg_ref, wclscr_ref, bclsi_ref,
                 emb_ref, lw_ref, lb_ref, wclst_ref, bclst_ref,
                 img_ref, txt_ref, *, hw, seq):
    """Whole forward pass in one grid step.

    Image path: both pointwise-conv+ReLU stand-in backbones as a single
    [N*HW, C] x [C, F] matmul each (batch folded into M), per-image adaptive
    average pooling via tile-aligned row-group sums, image classifier as split
    matmuls against pre-split weight halves (equivalent to concat -> Linear).

    Text path: stand-in BERT stack as [B*S, H] x [H, H] per layer; selected
    hidden states are sequence-mean pooled to [B, H]; the text classifier
    accumulates split matmuls against the per-slot [H, OPAD] weight blocks.
    """
    # ------------------------------ image path ------------------------------
    n_img = bg_ref.shape[0] // hw

    x_bg = bg_ref[...].astype(jnp.bfloat16)           # [N*HW, C]
    x_cr = cr_ref[...].astype(jnp.bfloat16)
    # TODO(synk): EfficientNet backbones replaced by pointwise conv + ReLU stand-ins.
    y_bg = jnp.maximum(
        jnp.dot(x_bg, wbg_ref[...], preferred_element_type=jnp.float32)
        + bbg_ref[...], 0.0)                          # [N*HW, F_bg] f32
    y_cr = jnp.maximum(
        jnp.dot(x_cr, wcr_ref[...], preferred_element_type=jnp.float32)
        + bcr_ref[...], 0.0)                          # [N*HW, F_cr] f32

    # AdaptiveAvgPool2d(1): per-image mean over HW rows; pool(cat) == cat(pool).
    p_bg = _group_mean(y_bg, hw, n_img)               # [N, F_bg] f32
    p_cr = _group_mean(y_cr, hw, n_img)               # [N, F_cr] f32

    # image_classifier: concat([bg, cr], -1) @ W == split matmuls (f32, tiny K).
    img_ref[...] = (
        jnp.dot(p_bg, wclsbg_ref[...], preferred_element_type=jnp.float32)
        + jnp.dot(p_cr, wclscr_ref[...], preferred_element_type=jnp.float32)
        + bclsi_ref[...])                             # [N, OPAD]

    # ------------------------------- text path ------------------------------
    b = emb_ref.shape[0] // seq
    n_layers = lw_ref.shape[0]
    n_hiddens = wclst_ref.shape[0]

    h = emb_ref[...]                                  # [B*S, H] f32
    # hidden_states[-0] == hidden_states[0]: concat slot 0 is the embedding output.
    acc = jnp.dot(_group_mean(h, seq, b), wclst_ref[0],
                  preferred_element_type=jnp.float32)  # [B, OPAD] f32

    for l in range(n_layers):
        # TODO(synk): pretrained BERT encoder layer replaced by dense + tanh stand-in.
        h = jnp.tanh(
            jnp.dot(h.astype(jnp.bfloat16), lw_ref[l],
                    preferred_element_type=jnp.float32) + lb_ref[l])
        slot = n_layers - l          # hidden_states[l + 1] == hidden_states[-slot]
        if 1 <= slot <= n_hiddens - 1:
            acc = acc + jnp.dot(_group_mean(h, seq, b), wclst_ref[slot],
                                preferred_element_type=jnp.float32)

    txt_ref[...] = acc + bclst_ref[...]               # [B, OPAD]


# ------------------------------ model wrapper --------------------------------

def init_params(key):
    ks = jax.random.split(key, 8)
    s = 0.02
    p = {}
    # TODO(synk): EfficientNet backbones replaced by a single pointwise conv + ReLU each.
    p["bg_w"] = (jax.random.normal(ks[0], (IMG_C, BG_FEATS), jnp.float32) * s
                 ).astype(jnp.bfloat16)
    p["bg_b"] = jnp.zeros((1, BG_FEATS), jnp.float32)
    p["cr_w"] = (jax.random.normal(ks[1], (IMG_C, CROP_FEATS), jnp.float32) * s
                 ).astype(jnp.bfloat16)
    p["cr_b"] = jnp.zeros((1, CROP_FEATS), jnp.float32)
    img_w = jax.random.normal(ks[2], (BG_FEATS + CROP_FEATS, OUT_FEATURES),
                              jnp.float32) * s
    img_w = jnp.pad(img_w, ((0, 0), (0, OPAD - OUT_FEATURES)))      # [56, OPAD] f32
    p["img_cls_w_bg"] = img_w[:BG_FEATS]                            # [32, OPAD]
    p["img_cls_w_cr"] = img_w[BG_FEATS:]                            # [24, OPAD]
    p["img_cls_b"] = jnp.zeros((1, OPAD), jnp.float32)
    # TODO(synk): BERT encoder replaced by embeddings + stacked dense/tanh layers.
    p["tok_emb"] = jax.random.normal(ks[3], (VOCAB, HIDDEN), jnp.float32) * s
    p["typ_emb"] = jax.random.normal(ks[4], (TYPE_VOCAB, HIDDEN), jnp.float32) * s
    p["layer_w"] = (jax.random.normal(ks[5], (BERT_LAYERS, HIDDEN, HIDDEN),
                                      jnp.float32) * s).astype(jnp.bfloat16)
    p["layer_b"] = jnp.zeros((BERT_LAYERS, 1, HIDDEN), jnp.float32)
    txt_w = jax.random.normal(ks[6], (HIDDEN * N_HIDDENS, OUT_FEATURES),
                              jnp.float32) * s
    txt_w = jnp.pad(txt_w, ((0, 0), (0, OPAD - OUT_FEATURES)))
    p["txt_cls_w"] = txt_w.reshape(N_HIDDENS, HIDDEN, OPAD)         # f32
    p["txt_cls_b"] = jnp.zeros((1, OPAD), jnp.float32)
    return p


def contrastive_forward(params, background_image, cropped_image,
                        input_ids, attention_mask, token_type_ids):
    n = background_image.shape[0]
    b = input_ids.shape[0]
    hw = IMG_H * IMG_W

    # layout: NCHW -> NHWC -> [N*HW, C]; batch folded into the matmul M dim.
    bg = jnp.transpose(background_image, (0, 2, 3, 1)).reshape(n * hw, IMG_C)
    cr = jnp.transpose(cropped_image, (0, 2, 3, 1)).reshape(n * hw, IMG_C)

    # Embedding gathers stay in plain JAX (glue); mask use is a stand-in.
    emb = (jnp.take(params["tok_emb"], input_ids, axis=0)
           + jnp.take(params["typ_emb"], token_type_ids, axis=0))
    emb = (emb * attention_mask[..., None].astype(jnp.float32)
           ).reshape(b * SEQ, HIDDEN)                               # [B*S, H]

    nfeat = BG_FEATS + CROP_FEATS
    flops = (2 * n * hw * IMG_C * nfeat + 2 * n * nfeat * OPAD
             + 2 * b * SEQ * HIDDEN * HIDDEN * BERT_LAYERS
             + 2 * b * HIDDEN * OPAD * N_HIDDENS)
    transc = b * SEQ * HIDDEN * BERT_LAYERS
    bytes_accessed = (2 * n * hw * IMG_C * 4
                      + IMG_C * nfeat * 2 + nfeat * 4
                      + nfeat * OPAD * 4 + OPAD * 4
                      + b * SEQ * HIDDEN * 4
                      + BERT_LAYERS * HIDDEN * HIDDEN * 2 + BERT_LAYERS * HIDDEN * 4
                      + N_HIDDENS * HIDDEN * OPAD * 4 + OPAD * 4
                      + (n + b) * OPAD * 4)

    def full(shape):
        return pl.BlockSpec(shape, lambda i: (0,) * len(shape))

    kernel = functools.partial(fused_kernel, hw=hw, seq=SEQ)

    img_pad, txt_pad = pl.pallas_call(
        kernel,
        out_shape=(jax.ShapeDtypeStruct((n, OPAD), jnp.float32),
                   jax.ShapeDtypeStruct((b, OPAD), jnp.float32)),
        grid=(1,),
        in_specs=[
            full((n * hw, IMG_C)), full((n * hw, IMG_C)),
            full((IMG_C, BG_FEATS)), full((1, BG_FEATS)),
            full((IMG_C, CROP_FEATS)), full((1, CROP_FEATS)),
            full((BG_FEATS, OPAD)), full((CROP_FEATS, OPAD)), full((1, OPAD)),
            full((b * SEQ, HIDDEN)),
            full((BERT_LAYERS, HIDDEN, HIDDEN)),
            full((BERT_LAYERS, 1, HIDDEN)),
            full((N_HIDDENS, HIDDEN, OPAD)), full((1, OPAD)),
        ],
        out_specs=(full((n, OPAD)), full((b, OPAD))),
        compiler_params=pltpu.CompilerParams(
            dimension_semantics=("arbitrary",),
            vmem_limit_bytes=_VMEM_LIMIT),
        cost_estimate=pl.CostEstimate(flops=flops, transcendentals=transc,
                                      bytes_accessed=bytes_accessed),
    )(bg, cr, params["bg_w"], params["bg_b"], params["cr_w"], params["cr_b"],
      params["img_cls_w_bg"], params["img_cls_w_cr"], params["img_cls_b"],
      emb, params["layer_w"], params["layer_b"],
      params["txt_cls_w"], params["txt_cls_b"])

    output_image = img_pad[:, :OUT_FEATURES]
    output_text = txt_pad[:, :OUT_FEATURES]
    return output_image, output_text


# ---------------------------------- main -------------------------------------

if __name__ == "__main__":
    key = jax.random.PRNGKey(0)
    k_param, k_bg, k_cr, k_ids = jax.random.split(key, 4)

    params = init_params(k_param)

    background_image = jax.random.normal(k_bg, (BATCH, IMG_C, IMG_H, IMG_W),
                                         jnp.float32)
    cropped_image = jax.random.normal(k_cr, (BATCH, IMG_C, IMG_H, IMG_W),
                                      jnp.float32)
    input_ids = jax.random.randint(k_ids, (BATCH, SEQ), 0, VOCAB, jnp.int32)
    attention_mask = jnp.ones((BATCH, SEQ), jnp.int32)
    token_type_ids = jnp.zeros((BATCH, SEQ), jnp.int32)

    fwd = jax.jit(contrastive_forward)
    out_image, out_text = fwd(params, background_image, cropped_image,
                              input_ids, attention_mask, token_type_ids)
    jax.block_until_ready((out_image, out_text))

    assert out_image.shape == (BATCH, OUT_FEATURES)
    assert out_text.shape == (BATCH, OUT_FEATURES)
    print("KERNEL_OK")
</pallas_src>

<mosaic_0001>
module attributes {stable_mosaic.version = 11 : i64} {
  func.func @fused_kernel(%arg0: i32, %arg1: memref<512x3xf32, #tpu.memory_space<vmem>>, %arg2: memref<512x3xf32, #tpu.memory_space<vmem>>, %arg3: memref<3x32xbf16, #tpu.memory_space<vmem>>, %arg4: memref<1x32xf32, #tpu.memory_space<vmem>>, %arg5: memref<3x24xbf16, #tpu.memory_space<vmem>>, %arg6: memref<1x24xf32, #tpu.memory_space<vmem>>, %arg7: memref<32x128xf32, #tpu.memory_space<vmem>>, %arg8: memref<24x128xf32, #tpu.memory_space<vmem>>, %arg9: memref<1x128xf32, #tpu.memory_space<vmem>>, %arg10: memref<16x32xf32, #tpu.memory_space<vmem>>, %arg11: memref<4x32x32xbf16, #tpu.memory_space<vmem>>, %arg12: memref<4x1x32xf32, #tpu.memory_space<vmem>>, %arg13: memref<3x32x128xf32, #tpu.memory_space<vmem>>, %arg14: memref<1x128xf32, #tpu.memory_space<vmem>>, %arg15: memref<2x128xf32, #tpu.memory_space<vmem>>, %arg16: memref<2x128xf32, #tpu.memory_space<vmem>>) attributes {dimension_semantics = [#tpu.dimension_semantics<arbitrary>], iteration_bounds = array<i64: 1>, scalar_prefetch = 0 : i64, scratch_operands = 0 : i64, tpu.core_type = #tpu.core_type<tc>, window_params = [{pipeline_mode = #tpu.pipeline_mode<synchronous>, transform_indices = @transform_0, window_bounds = array<i64: 512, 3>}, {pipeline_mode = #tpu.pipeline_mode<synchronous>, transform_indices = @transform_1, window_bounds = array<i64: 512, 3>}, {pipeline_mode = #tpu.pipeline_mode<synchronous>, transform_indices = @transform_2, window_bounds = array<i64: 3, 32>}, {pipeline_mode = #tpu.pipeline_mode<synchronous>, transform_indices = @transform_3, window_bounds = array<i64: 1, 32>}, {pipeline_mode = #tpu.pipeline_mode<synchronous>, transform_indices = @transform_4, window_bounds = array<i64: 3, 24>}, {pipeline_mode = #tpu.pipeline_mode<synchronous>, transform_indices = @transform_5, window_bounds = array<i64: 1, 24>}, {pipeline_mode = #tpu.pipeline_mode<synchronous>, transform_indices = @transform_6, window_bounds = array<i64: 32, 128>}, {pipeline_mode = #tpu.pipeline_mode<synchronous>, transform_indices = @transform_7, window_bounds = array<i64: 24, 128>}, {pipeline_mode = #tpu.pipeline_mode<synchronous>, transform_indices = @transform_8, window_bounds = array<i64: 1, 128>}, {pipeline_mode = #tpu.pipeline_mode<synchronous>, transform_indices = @transform_9, window_bounds = array<i64: 16, 32>}, {pipeline_mode = #tpu.pipeline_mode<synchronous>, transform_indices = @transform_10, window_bounds = array<i64: 4, 32, 32>}, {pipeline_mode = #tpu.pipeline_mode<synchronous>, transform_indices = @transform_11, window_bounds = array<i64: 4, 1, 32>}, {pipeline_mode = #tpu.pipeline_mode<synchronous>, transform_indices = @transform_12, window_bounds = array<i64: 3, 32, 128>}, {pipeline_mode = #tpu.pipeline_mode<synchronous>, transform_indices = @transform_13, window_bounds = array<i64: 1, 128>}, {pipeline_mode = #tpu.pipeline_mode<synchronous>, transform_indices = @transform_14, window_bounds = array<i64: 2, 128>}, {pipeline_mode = #tpu.pipeline_mode<synchronous>, transform_indices = @transform_15, window_bounds = array<i64: 2, 128>}]} {
    %c0 = arith.constant 0 : index
    %c0_0 = arith.constant 0 : index
    %0 = vector.load %arg1[%c0, %c0_0] : memref<512x3xf32, #tpu.memory_space<vmem>>, vector<512x3xf32>
    %1 = arith.truncf %0 : vector<512x3xf32> to vector<512x3xbf16>
    %c0_1 = arith.constant 0 : index
    %c0_2 = arith.constant 0 : index
    %2 = vector.load %arg2[%c0_1, %c0_2] : memref<512x3xf32, #tpu.memory_space<vmem>>, vector<512x3xf32>
    %3 = arith.truncf %2 : vector<512x3xf32> to vector<512x3xbf16>
    %c0_3 = arith.constant 0 : index
    %c0_4 = arith.constant 0 : index
    %4 = vector.load %arg3[%c0_3, %c0_4] : memref<3x32xbf16, #tpu.memory_space<vmem>>, vector<3x32xbf16>
    %cst = arith.constant dense<0.000000e+00> : vector<512x32xf32>
    %5 = tpu.matmul %1, %4, %cst {dimension_numbers = #tpu.dot_dimension_numbers<[1], [0], [0], [1], [0, 0, 1, 1], [], []>} : vector<512x3xbf16>, vector<3x32xbf16>, vector<512x32xf32> -> vector<512x32xf32>
    %c0_5 = arith.constant 0 : index
    %c0_6 = arith.constant 0 : index
    %6 = vector.load %arg4[%c0_5, %c0_6] : memref<1x32xf32, #tpu.memory_space<vmem>>, vector<1x32xf32>
    %7 = vector.broadcast %6 : vector<1x32xf32> to vector<512x32xf32>
    %8 = arith.addf %5, %7 : vector<512x32xf32>
    %cst_7 = arith.constant 0.000000e+00 : f32
    %9 = vector.broadcast %cst_7 : f32 to vector<512x32xf32>
    %10 = arith.maximumf %8, %9 : vector<512x32xf32>
    %c0_8 = arith.constant 0 : index
    %c0_9 = arith.constant 0 : index
    %11 = vector.load %arg5[%c0_8, %c0_9] : memref<3x24xbf16, #tpu.memory_space<vmem>>, vector<3x24xbf16>
    %cst_10 = arith.constant dense<0.000000e+00> : vector<512x24xf32>
    %12 = tpu.matmul %3, %11, %cst_10 {dimension_numbers = #tpu.dot_dimension_numbers<[1], [0], [0], [1], [0, 0, 1, 1], [], []>} : vector<512x3xbf16>, vector<3x24xbf16>, vector<512x24xf32> -> vector<512x24xf32>
    %c0_11 = arith.constant 0 : index
    %c0_12 = arith.constant 0 : index
    %13 = vector.load %arg6[%c0_11, %c0_12] : memref<1x24xf32, #tpu.memory_space<vmem>>, vector<1x24xf32>
    %14 = vector.broadcast %13 : vector<1x24xf32> to vector<512x24xf32>
    %15 = arith.addf %12, %14 : vector<512x24xf32>
    %cst_13 = arith.constant 0.000000e+00 : f32
    %16 = vector.broadcast %cst_13 : f32 to vector<512x24xf32>
    %17 = arith.maximumf %15, %16 : vector<512x24xf32>
    %18 = vector.extract_strided_slice %10 {offsets = [0, 0], sizes = [256, 32], strides = [1, 1]} : vector<512x32xf32> to vector<256x32xf32>
    %cst_14 = arith.constant dense<0.000000e+00> : vector<32xf32>
    %19 = vector.multi_reduction <add>, %18, %cst_14 [0] : vector<256x32xf32> to vector<32xf32>
    %20 = vector.shape_cast %19 : vector<32xf32> to vector<1x32xf32>
    %21 = vector.extract_strided_slice %10 {offsets = [256, 0], sizes = [256, 32], strides = [1, 1]} : vector<512x32xf32> to vector<256x32xf32>
    %cst_15 = arith.constant dense<0.000000e+00> : vector<32xf32>
    %22 = vector.multi_reduction <add>, %21, %cst_15 [0] : vector<256x32xf32> to vector<32xf32>
    %23 = vector.shape_cast %22 : vector<32xf32> to vector<1x32xf32>
    %24 = tpu.concatenate %20, %23 in 0 : vector<1x32xf32>, vector<1x32xf32> -> vector<2x32xf32>
    %cst_16 = arith.constant 3.906250e-03 : f32
    %25 = vector.broadcast %cst_16 : f32 to vector<2x32xf32>
    %26 = arith.mulf %24, %25 : vector<2x32xf32>
    %27 = vector.extract_strided_slice %17 {offsets = [0, 0], sizes = [256, 24], strides = [1, 1]} : vector<512x24xf32> to vector<256x24xf32>
    %cst_17 = arith.constant dense<0.000000e+00> : vector<24xf32>
    %28 = vector.multi_reduction <add>, %27, %cst_17 [0] : vector<256x24xf32> to vector<24xf32>
    %29 = vector.shape_cast %28 : vector<24xf32> to vector<1x24xf32>
    %30 = vector.extract_strided_slice %17 {offsets = [256, 0], sizes = [256, 24], strides = [1, 1]} : vector<512x24xf32> to vector<256x24xf32>
    %cst_18 = arith.constant dense<0.000000e+00> : vector<24xf32>
    %31 = vector.multi_reduction <add>, %30, %cst_18 [0] : vector<256x24xf32> to vector<24xf32>
    %32 = vector.shape_cast %31 : vector<24xf32> to vector<1x24xf32>
    %33 = tpu.concatenate %29, %32 in 0 : vector<1x24xf32>, vector<1x24xf32> -> vector<2x24xf32>
    %cst_19 = arith.constant 3.906250e-03 : f32
    %34 = vector.broadcast %cst_19 : f32 to vector<2x24xf32>
    %35 = arith.mulf %33, %34 : vector<2x24xf32>
    %c0_20 = arith.constant 0 : index
    %c0_21 = arith.constant 0 : index
    %36 = vector.load %arg7[%c0_20, %c0_21] : memref<32x128xf32, #tpu.memory_space<vmem>>, vector<32x128xf32>
    %cst_22 = arith.constant dense<0.000000e+00> : vector<2x128xf32>
    %37 = tpu.matmul %26, %36, %cst_22 {dimension_numbers = #tpu.dot_dimension_numbers<[1], [0], [0], [1], [0, 0, 1, 1], [], []>} : vector<2x32xf32>, vector<32x128xf32>, vector<2x128xf32> -> vector<2x128xf32>
    %c0_23 = arith.constant 0 : index
    %c0_24 = arith.constant 0 : index
    %38 = vector.load %arg8[%c0_23, %c0_24] : memref<24x128xf32, #tpu.memory_space<vmem>>, vector<24x128xf32>
    %cst_25 = arith.constant dense<0.000000e+00> : vector<2x128xf32>
    %39 = tpu.matmul %35, %38, %cst_25 {dimension_numbers = #tpu.dot_dimension_numbers<[1], [0], [0], [1], [0, 0, 1, 1], [], []>} : vector<2x24xf32>, vector<24x128xf32>, vector<2x128xf32> -> vector<2x128xf32>
    %40 = arith.addf %37, %39 : vector<2x128xf32>
    %c0_26 = arith.constant 0 : index
    %c0_27 = arith.constant 0 : index
    %41 = vector.load %arg9[%c0_26, %c0_27] : memref<1x128xf32, #tpu.memory_space<vmem>>, vector<1x128xf32>
    %42 = vector.broadcast %41 : vector<1x128xf32> to vector<2x128xf32>
    %43 = arith.addf %40, %42 : vector<2x128xf32>
    %c0_28 = arith.constant 0 : index
    %c0_29 = arith.constant 0 : index
    %44 = vector.load %arg15[%c0_28, %c0_29] : memref<2x128xf32, #tpu.memory_space<vmem>>, vector<2x128xf32>
    tpu.vector_store %arg15[%c0_28, %c0_29], %43 {strides = array<i32>} : memref<2x128xf32, #tpu.memory_space<vmem>>, vector<2x128xf32>,
    %c0_30 = arith.constant 0 : index
    %c0_31 = arith.constant 0 : index
    %45 = vector.load %arg10[%c0_30, %c0_31] : memref<16x32xf32, #tpu.memory_space<vmem>>, vector<16x32xf32>
    %46 = vector.extract_strided_slice %45 {offsets = [0, 0], sizes = [8, 32], strides = [1, 1]} : vector<16x32xf32> to vector<8x32xf32>
    %cst_32 = arith.constant dense<0.000000e+00> : vector<32xf32>
    %47 = vector.multi_reduction <add>, %46, %cst_32 [0] : vector<8x32xf32> to vector<32xf32>
    %48 = vector.shape_cast %47 : vector<32xf32> to vector<1x32xf32>
    %49 = vector.extract_strided_slice %45 {offsets = [8, 0], sizes = [8, 32], strides = [1, 1]} : vector<16x32xf32> to vector<8x32xf32>
    %cst_33 = arith.constant dense<0.000000e+00> : vector<32xf32>
    %50 = vector.multi_reduction <add>, %49, %cst_33 [0] : vector<8x32xf32> to vector<32xf32>
    %51 = vector.shape_cast %50 : vector<32xf32> to vector<1x32xf32>
    %52 = tpu.concatenate %48, %51 in 0 : vector<1x32xf32>, vector<1x32xf32> -> vector<2x32xf32>
    %cst_34 = arith.constant 1.250000e-01 : f32
    %53 = vector.broadcast %cst_34 : f32 to vector<2x32xf32>
    %54 = arith.mulf %52, %53 : vector<2x32xf32>
    %c0_35 = arith.constant 0 : index
    %c0_36 = arith.constant 0 : index
    %c0_37 = arith.constant 0 : index
    %55 = vector.load %arg13[%c0_35, %c0_36, %c0_37] : memref<3x32x128xf32, #tpu.memory_space<vmem>>, vector<1x32x128xf32>
    %56 = vector.shape_cast %55 : vector<1x32x128xf32> to vector<32x128xf32>
    %cst_38 = arith.constant dense<0.000000e+00> : vector<2x128xf32>
    %57 = tpu.matmul %54, %56, %cst_38 {dimension_numbers = #tpu.dot_dimension_numbers<[1], [0], [0], [1], [0, 0, 1, 1], [], []>} : vector<2x32xf32>, vector<32x128xf32>, vector<2x128xf32> -> vector<2x128xf32>
    %58 = arith.truncf %45 : vector<16x32xf32> to vector<16x32xbf16>
    %c0_39 = arith.constant 0 : index
    %c0_40 = arith.constant 0 : index
    %c0_41 = arith.constant 0 : index
    %59 = vector.load %arg11[%c0_39, %c0_40, %c0_41] : memref<4x32x32xbf16, #tpu.memory_space<vmem>>, vector<1x32x32xbf16>
    %60 = vector.shape_cast %59 : vector<1x32x32xbf16> to vector<32x32xbf16>
    %cst_42 = arith.constant dense<0.000000e+00> : vector<16x32xf32>
    %61 = tpu.matmul %58, %60, %cst_42 {dimension_numbers = #tpu.dot_dimension_numbers<[1], [0], [0], [1], [0, 0, 1, 1], [], []>} : vector<16x32xbf16>, vector<32x32xbf16>, vector<16x32xf32> -> vector<16x32xf32>
    %c0_43 = arith.constant 0 : index
    %c0_44 = arith.constant 0 : index
    %c0_45 = arith.constant 0 : index
    %62 = vector.load %arg12[%c0_43, %c0_44, %c0_45] : memref<4x1x32xf32, #tpu.memory_space<vmem>>, vector<1x1x32xf32>
    %63 = vector.shape_cast %62 : vector<1x1x32xf32> to vector<1x32xf32>
    %64 = vector.broadcast %63 : vector<1x32xf32> to vector<16x32xf32>
    %65 = arith.addf %61, %64 : vector<16x32xf32>
    %66 = math.tanh %65 : vector<16x32xf32>
    %67 = arith.truncf %66 : vector<16x32xf32> to vector<16x32xbf16>
    %c1 = arith.constant 1 : index
    %c0_46 = arith.constant 0 : index
    %c0_47 = arith.constant 0 : index
    %68 = vector.load %arg11[%c1, %c0_46, %c0_47] : memref<4x32x32xbf16, #tpu.memory_space<vmem>>, vector<1x32x32xbf16>
    %69 = vector.shape_cast %68 : vector<1x32x32xbf16> to vector<32x32xbf16>
    %cst_48 = arith.constant dense<0.000000e+00> : vector<16x32xf32>
    %70 = tpu.matmul %67, %69, %cst_48 {dimension_numbers = #tpu.dot_dimension_numbers<[1], [0], [0], [1], [0, 0, 1, 1], [], []>} : vector<16x32xbf16>, vector<32x32xbf16>, vector<16x32xf32> -> vector<16x32xf32>
    %c1_49 = arith.constant 1 : index
    %c0_50 = arith.constant 0 : index
    %c0_51 = arith.constant 0 : index
    %71 = vector.load %arg12[%c1_49, %c0_50, %c0_51] : memref<4x1x32xf32, #tpu.memory_space<vmem>>, vector<1x1x32xf32>
    %72 = vector.shape_cast %71 : vector<1x1x32xf32> to vector<1x32xf32>
    %73 = vector.broadcast %72 : vector<1x32xf32> to vector<16x32xf32>
    %74 = arith.addf %70, %73 : vector<16x32xf32>
    %75 = math.tanh %74 : vector<16x32xf32>
    %76 = arith.truncf %75 : vector<16x32xf32> to vector<16x32xbf16>
    %c2 = arith.constant 2 : index
    %c0_52 = arith.constant 0 : index
    %c0_53 = arith.constant 0 : index
    %77 = vector.load %arg11[%c2, %c0_52, %c0_53] : memref<4x32x32xbf16, #tpu.memory_space<vmem>>, vector<1x32x32xbf16>
    %78 = vector.shape_cast %77 : vector<1x32x32xbf16> to vector<32x32xbf16>
    %cst_54 = arith.constant dense<0.000000e+00> : vector<16x32xf32>
    %79 = tpu.matmul %76, %78, %cst_54 {dimension_numbers = #tpu.dot_dimension_numbers<[1], [0], [0], [1], [0, 0, 1, 1], [], []>} : vector<16x32xbf16>, vector<32x32xbf16>, vector<16x32xf32> -> vector<16x32xf32>
    %c2_55 = arith.constant 2 : index
    %c0_56 = arith.constant 0 : index
    %c0_57 = arith.constant 0 : index
    %80 = vector.load %arg12[%c2_55, %c0_56, %c0_57] : memref<4x1x32xf32, #tpu.memory_space<vmem>>, vector<1x1x32xf32>
    %81 = vector.shape_cast %80 : vector<1x1x32xf32> to vector<1x32xf32>
    %82 = vector.broadcast %81 : vector<1x32xf32> to vector<16x32xf32>
    %83 = arith.addf %79, %82 : vector<16x32xf32>
    %84 = math.tanh %83 : vector<16x32xf32>
    %85 = vector.extract_strided_slice %84 {offsets = [0, 0], sizes = [8, 32], strides = [1, 1]} : vector<16x32xf32> to vector<8x32xf32>
    %cst_58 = arith.constant dense<0.000000e+00> : vector<32xf32>
    %86 = vector.multi_reduction <add>, %85, %cst_58 [0] : vector<8x32xf32> to vector<32xf32>
    %87 = vector.shape_cast %86 : vector<32xf32> to vector<1x32xf32>
    %88 = vector.extract_strided_slice %84 {offsets = [8, 0], sizes = [8, 32], strides = [1, 1]} : vector<16x32xf32> to vector<8x32xf32>
    %cst_59 = arith.constant dense<0.000000e+00> : vector<32xf32>
    %89 = vector.multi_reduction <add>, %88, %cst_59 [0] : vector<8x32xf32> to vector<32xf32>
    %90 = vector.shape_cast %89 : vector<32xf32> to vector<1x32xf32>
    %91 = tpu.concatenate %87, %90 in 0 : vector<1x32xf32>, vector<1x32xf32> -> vector<2x32xf32>
    %cst_60 = arith.constant 1.250000e-01 : f32
    %92 = vector.broadcast %cst_60 : f32 to vector<2x32xf32>
    %93 = arith.mulf %91, %92 : vector<2x32xf32>
    %c2_61 = arith.constant 2 : index
    %c0_62 = arith.constant 0 : index
    %c0_63 = arith.constant 0 : index
    %94 = vector.load %arg13[%c2_61, %c0_62, %c0_63] : memref<3x32x128xf32, #tpu.memory_space<vmem>>, vector<1x32x128xf32>
    %95 = vector.shape_cast %94 : vector<1x32x128xf32> to vector<32x128xf32>
    %cst_64 = arith.constant dense<0.000000e+00> : vector<2x128xf32>
    %96 = tpu.matmul %93, %95, %cst_64 {dimension_numbers = #tpu.dot_dimension_numbers<[1], [0], [0], [1], [0, 0, 1, 1], [], []>} : vector<2x32xf32>, vector<32x128xf32>, vector<2x128xf32> -> vector<2x128xf32>
    %97 = arith.addf %57, %96 : vector<2x128xf32>
    %98 = arith.truncf %84 : vector<16x32xf32> to vector<16x32xbf16>
    %c3 = arith.constant 3 : index
    %c0_65 = arith.constant 0 : index
    %c0_66 = arith.constant 0 : index
    %99 = vector.load %arg11[%c3, %c0_65, %c0_66] : memref<4x32x32xbf16, #tpu.memory_space<vmem>>, vector<1x32x32xbf16>
    %100 = vector.shape_cast %99 : vector<1x32x32xbf16> to vector<32x32xbf16>
    %cst_67 = arith.constant dense<0.000000e+00> : vector<16x32xf32>
    %101 = tpu.matmul %98, %100, %cst_67 {dimension_numbers = #tpu.dot_dimension_numbers<[1], [0], [0], [1], [0, 0, 1, 1], [], []>} : vector<16x32xbf16>, vector<32x32xbf16>, vector<16x32xf32> -> vector<16x32xf32>
    %c3_68 = arith.constant 3 : index
    %c0_69 = arith.constant 0 : index
    %c0_70 = arith.constant 0 : index
    %102 = vector.load %arg12[%c3_68, %c0_69, %c0_70] : memref<4x1x32xf32, #tpu.memory_space<vmem>>, vector<1x1x32xf32>
    %103 = vector.shape_cast %102 : vector<1x1x32xf32> to vector<1x32xf32>
    %104 = vector.broadcast %103 : vector<1x32xf32> to vector<16x32xf32>
    %105 = arith.addf %101, %104 : vector<16x32xf32>
    %106 = math.tanh %105 : vector<16x32xf32>
    %107 = vector.extract_strided_slice %106 {offsets = [0, 0], sizes = [8, 32], strides = [1, 1]} : vector<16x32xf32> to vector<8x32xf32>
    %cst_71 = arith.constant dense<0.000000e+00> : vector<32xf32>
    %108 = vector.multi_reduction <add>, %107, %cst_71 [0] : vector<8x32xf32> to vector<32xf32>
    %109 = vector.shape_cast %108 : vector<32xf32> to vector<1x32xf32>
    %110 = vector.extract_strided_slice %106 {offsets = [8, 0], sizes = [8, 32], strides = [1, 1]} : vector<16x32xf32> to vector<8x32xf32>
    %cst_72 = arith.constant dense<0.000000e+00> : vector<32xf32>
    %111 = vector.multi_reduction <add>, %110, %cst_72 [0] : vector<8x32xf32> to vector<32xf32>
    %112 = vector.shape_cast %111 : vector<32xf32> to vector<1x32xf32>
    %113 = tpu.concatenate %109, %112 in 0 : vector<1x32xf32>, vector<1x32xf32> -> vector<2x32xf32>
    %cst_73 = arith.constant 1.250000e-01 : f32
    %114 = vector.broadcast %cst_73 : f32 to vector<2x32xf32>
    %115 = arith.mulf %113, %114 : vector<2x32xf32>
    %c1_74 = arith.constant 1 : index
    %c0_75 = arith.constant 0 : index
    %c0_76 = arith.constant 0 : index
    %116 = vector.load %arg13[%c1_74, %c0_75, %c0_76] : memref<3x32x128xf32, #tpu.memory_space<vmem>>, vector<1x32x128xf32>
    %117 = vector.shape_cast %116 : vector<1x32x128xf32> to vector<32x128xf32>
    %cst_77 = arith.constant dense<0.000000e+00> : vector<2x128xf32>
    %118 = tpu.matmul %115, %117, %cst_77 {dimension_numbers = #tpu.dot_dimension_numbers<[1], [0], [0], [1], [0, 0, 1, 1], [], []>} : vector<2x32xf32>, vector<32x128xf32>, vector<2x128xf32> -> vector<2x128xf32>
    %119 = arith.addf %97, %118 : vector<2x128xf32>
    %c0_78 = arith.constant 0 : index
    %c0_79 = arith.constant 0 : index
    %120 = vector.load %arg14[%c0_78, %c0_79] : memref<1x128xf32, #tpu.memory_space<vmem>>, vector<1x128xf32>
    %121 = vector.broadcast %120 : vector<1x128xf32> to vector<2x128xf32>
    %122 = arith.addf %119, %121 : vector<2x128xf32>
    %c0_80 = arith.constant 0 : index
    %c0_81 = arith.constant 0 : index
    %123 = vector.load %arg16[%c0_80, %c0_81] : memref<2x128xf32, #tpu.memory_space<vmem>>, vector<2x128xf32>
    tpu.vector_store %arg16[%c0_80, %c0_81], %122 {strides = array<i32>} : memref<2x128xf32, #tpu.memory_space<vmem>>, vector<2x128xf32>,
    return
  }
  func.func @transform_0(%arg0: i32) -> (i32, i32) {
    %c0_i32 = arith.constant 0 : i32
    %c0_i32_0 = arith.constant 0 : i32
    %c0_i32_1 = arith.constant 0 : i32
    return %c0_i32, %c0_i32_0 : i32, i32
  }
  func.func @transform_1(%arg0: i32) -> (i32, i32) {
    %c0_i32 = arith.constant 0 : i32
    %c0_i32_0 = arith.constant 0 : i32
    %c0_i32_1 = arith.constant 0 : i32
    return %c0_i32, %c0_i32_0 : i32, i32
  }
  func.func @transform_2(%arg0: i32) -> (i32, i32) {
    %c0_i32 = arith.constant 0 : i32
    %c0_i32_0 = arith.constant 0 : i32
    %c0_i32_1 = arith.constant 0 : i32
    return %c0_i32, %c0_i32_0 : i32, i32
  }
  func.func @transform_3(%arg0: i32) -> (i32, i32) {
    %c0_i32 = arith.constant 0 : i32
    %c0_i32_0 = arith.constant 0 : i32
    %c0_i32_1 = arith.constant 0 : i32
    return %c0_i32, %c0_i32_0 : i32, i32
  }
  func.func @transform_4(%arg0: i32) -> (i32, i32) {
    %c0_i32 = arith.constant 0 : i32
    %c0_i32_0 = arith.constant 0 : i32
    %c0_i32_1 = arith.constant 0 : i32
    return %c0_i32, %c0_i32_0 : i32, i32
  }
  func.func @transform_5(%arg0: i32) -> (i32, i32) {
    %c0_i32 = arith.constant 0 : i32
    %c0_i32_0 = arith.constant 0 : i32
    %c0_i32_1 = arith.constant 0 : i32
    return %c0_i32, %c0_i32_0 : i32, i32
  }
  func.func @transform_6(%arg0: i32) -> (i32, i32) {
    %c0_i32 = arith.constant 0 : i32
    %c0_i32_0 = arith.constant 0 : i32
    %c0_i32_1 = arith.constant 0 : i32
    return %c0_i32, %c0_i32_0 : i32, i32
  }
  func.func @transform_7(%arg0: i32) -> (i32, i32) {
    %c0_i32 = arith.constant 0 : i32
    %c0_i32_0 = arith.constant 0 : i32
    %c0_i32_1 = arith.constant 0 : i32
    return %c0_i32, %c0_i32_0 : i32, i32
  }
  func.func @transform_8(%arg0: i32) -> (i32, i32) {
    %c0_i32 = arith.constant 0 : i32
    %c0_i32_0 = arith.constant 0 : i32
    %c0_i32_1 = arith.constant 0 : i32
    return %c0_i32, %c0_i32_0 : i32, i32
  }
  func.func @transform_9(%arg0: i32) -> (i32, i32) {
    %c0_i32 = arith.constant 0 : i32
    %c0_i32_0 = arith.constant 0 : i32
    %c0_i32_1 = arith.constant 0 : i32
    return %c0_i32, %c0_i32_0 : i32, i32
  }
  func.func @transform_10(%arg0: i32) -> (i32, i32, i32) {
    %c0_i32 = arith.constant 0 : i32
    %c0_i32_0 = arith.constant 0 : i32
    %c0_i32_1 = arith.constant 0 : i32
    %c0_i32_2 = arith.constant 0 : i32
    return %c0_i32, %c0_i32_0, %c0_i32_1 : i32, i32, i32
  }
  func.func @transform_11(%arg0: i32) -> (i32, i32, i32) {
    %c0_i32 = arith.constant 0 : i32
    %c0_i32_0 = arith.constant 0 : i32
    %c0_i32_1 = arith.constant 0 : i32
    %c0_i32_2 = arith.constant 0 : i32
    return %c0_i32, %c0_i32_0, %c0_i32_1 : i32, i32, i32
  }
  func.func @transform_12(%arg0: i32) -> (i32, i32, i32) {
    %c0_i32 = arith.constant 0 : i32
    %c0_i32_0 = arith.constant 0 : i32
    %c0_i32_1 = arith.constant 0 : i32
    %c0_i32_2 = arith.constant 0 : i32
    return %c0_i32, %c0_i32_0, %c0_i32_1 : i32, i32, i32
  }
  func.func @transform_13(%arg0: i32) -> (i32, i32) {
    %c0_i32 = arith.constant 0 : i32
    %c0_i32_0 = arith.constant 0 : i32
    %c0_i32_1 = arith.constant 0 : i32
    return %c0_i32, %c0_i32_0 : i32, i32
  }
  func.func @transform_14(%arg0: i32) -> (i32, i32) {
    %c0_i32 = arith.constant 0 : i32
    %c0_i32_0 = arith.constant 0 : i32
    %c0_i32_1 = arith.constant 0 : i32
    return %c0_i32, %c0_i32_0 : i32, i32
  }
  func.func @transform_15(%arg0: i32) -> (i32, i32) {
    %c0_i32 = arith.constant 0 : i32
    %c0_i32_0 = arith.constant 0 : i32
    %c0_i32_1 = arith.constant 0 : i32
    return %c0_i32, %c0_i32_0 : i32, i32
  }
}

</mosaic_0001>

<bundles_post_ra>
// kernel: contrastive_forward.1
= control target key start
LH: loop header
LB: loop body
LE: loop exit
PB: predicated region body
PF: predicated region fallthrough
CT: control target
= control target key end

     0   :  { %21 = vsyncpa [#allocation3], 0  ;;  %vm346_vm0 = vcmask 1040384   ;;  %vm347_vm1 = vcmask 1041408   ;;  %v1821_v2 = vmov 65535   ;;  %vm249_vm2 = vcmask 23552   ;;  %s2930_s0 = inlined_call_operand.vmem [shape: f32[512,3], index: 0, kind: input, shape index: {}]   ;;  %s2931_s1 = inlined_call_operand.vmem [shape: f32[512,3], index: 1, kind: input, shape index: {}]   ;;  %s2932_s2 = inlined_call_operand.vmem [shape: bf16[3,32], index: 2, kind: input, shape index: {}]   ;;  %s2933_s3 = inlined_call_operand.vmem [shape: f32[1,32], index: 3, kind: input, shape index: {}]   ;;  %s2934_s4 = inlined_call_operand.vmem [shape: bf16[3,24], index: 4, kind: input, shape index: {}]   ;;  %s2935_s5 = inlined_call_operand.vmem [shape: f32[1,24], index: 5, kind: input, shape index: {}]   ;;  %s2936_s6 = inlined_call_operand.vmem [shape: f32[32,128], index: 6, kind: input, shape index: {}]   ;;  %s2937_s7 = inlined_call_operand.vmem [shape: f32[24,128], index: 7, kind: input, shape index: {}]   ;;  %s2938_s8 = inlined_call_operand.vmem [shape: f32[1,128], index: 8, kind: input, shape index: {}]   ;;  %s2939_s9 = inlined_call_operand.vmem [shape: f32[16,32], index: 9, kind: input, shape index: {}]   ;;  %s2940_s10 = inlined_call_operand.vmem [shape: bf16[4,32,32], index: 10, kind: input, shape index: {}]   ;;  %s2941_s11 = inlined_call_operand.vmem [shape: f32[4,1,32], index: 11, kind: input, shape index: {}]   ;;  %s2942_s12 = inlined_call_operand.vmem [shape: f32[3,32,128], index: 12, kind: input, shape index: {}]   ;;  %s2943_s13 = inlined_call_operand.vmem [shape: f32[1,128], index: 13, kind: input, shape index: {}]   ;;  %s2944_s14 = inlined_call_operand.hbm [shape: f32[2,128], index: 14, kind: output, shape index: {0}]   ;;  %s2945_s15 = inlined_call_operand.hbm [shape: f32[2,128], index: 15, kind: output, shape index: {1}]  }
   0x1   :  { %v244_v0 = vld [vmem:[%s2932_s2] sm:$0x3]  ;;  %v348_v3 = vsel %vm346_vm0, 4294967295, %v1821_v2  ;;  %v53_v5 = vld [vmem:[%s2930_s0 + $0x8] sm:$0xff] }
   0x2   :  { %v52_v1 = vld [vmem:[%s2930_s0] sm:$0xff]  ;;  %v349_v7 = vsel %vm347_vm1, %v348_v3, 0  ;;  %v149_v8 = vld [vmem:[%s2931_s1 + $0x8] sm:$0xff] }
   0x3   :  { %v586_v4 = vld [vmem:[%s2934_s4] sm:$0x3]  ;;  %v351_v9 = vand.u32 %v349_v7, %v244_v0  ;;  %v116_v11 = vpack.c.bf16 %v53_v5, %v52_v1 }
   0x4   :  { %v148_v6 = vld [vmem:[%s2931_s1] sm:$0xff]  ;;  %v688_v10 = vand.u32 %v586_v4, %v349_v7 }
   0x5   :  { %v212_v12 = vpack.c.bf16 %v149_v8, %v148_v6  ;;  %360 = vmatpush.bf16.msra.mxu0 %v351_v9  ;;  %1738 = vmatpush.bf16.msra.mxu3 %v351_v9 }
   0x6   :  { %697 = vmatpush.bf16.msra.mxu1 %v688_v10  ;;  %1739 = vmatpush.bf16.msra.mxu2 %v688_v10 }
   0x7   :  { %22 = vsyncpa [#allocation5], 0  ;;  %v54_v13 = vld [vmem:[%s2930_s0 + $0x10] sm:$0xff]  ;;  %v55_v14 = vld [vmem:[%s2930_s0 + $0x18] sm:$0xff]  ;;  %vm923_vm3 = vcmask 261120   ;;  %vm1064_vm4 = vcmask 195584  }
   0x8   :  { %1602 = vmatmul.msk.bf16.vlgmr.msra.gmra.mxu0 %vm249_vm2, %v116_v11  ;;  %v150_v15 = vld [vmem:[%s2931_s1 + $0x10] sm:$0xff]  ;;  %v151_v16 = vld [vmem:[%s2931_s1 + $0x18] sm:$0xff]  ;;  %v117_v17 = vpack.c.bf16 %v55_v14, %v54_v13  ;;  %v56_v19 = vld [vmem:[%s2930_s0 + $0x20] sm:$0xff]  ;;  %s1577_s26 = sshll.u32 %s2944_s14, 4  ;;  %s1588_s29 = sshll.u32 %s2945_s15, 4  ;;  %s1578_s26 = int_to_ptr.hbm [resolvable:$true] %s1577_s26  ;;  %s1589_s29 = int_to_ptr.hbm [resolvable:$true] %s1588_s29 }
   0x9   :  { %1634 = vmatmul.msk.bf16.vlgmr.msra.gmra.mxu1 %vm249_vm2, %v212_v12  ;;  %v213_v18 = vpack.c.bf16 %v151_v16, %v150_v15  ;;  %v57_v20 = vld [vmem:[%s2930_s0 + $0x28] sm:$0xff]  ;;  %v152_v21 = vld [vmem:[%s2931_s1 + $0x20] sm:$0xff]  ;;  %v58_v25 = vld [vmem:[%s2930_s0 + $0x30] sm:$0xff] }
   0xa   :  { %v153_v22 = vld [vmem:[%s2931_s1 + $0x28] sm:$0xff]  ;;  %v118_v23 = vpack.c.bf16 %v57_v20, %v56_v19  ;;  %v59_v26 = vld [vmem:[%s2930_s0 + $0x38] sm:$0xff]  ;;  %v154_v27 = vld [vmem:[%s2931_s1 + $0x30] sm:$0xff] }
   0xb   :  { %v214_v24 = vpack.c.bf16 %v153_v22, %v152_v21  ;;  %v155_v28 = vld [vmem:[%s2931_s1 + $0x38] sm:$0xff]  ;;  %v119_v29 = vpack.c.bf16 %v59_v26, %v58_v25  ;;  %v60_v31 = vld [vmem:[%s2930_s0 + $0x40] sm:$0xff]  ;;  %v61_v32 = vld [vmem:[%s2930_s0 + $0x48] sm:$0xff] }
   0xc   :  { %v215_v30 = vpack.c.bf16 %v155_v28, %v154_v27  ;;  %v156_v33 = vld [vmem:[%s2931_s1 + $0x40] sm:$0xff]  ;;  %v157_v34 = vld [vmem:[%s2931_s1 + $0x48] sm:$0xff]  ;;  %v120_v35 = vpack.c.bf16 %v61_v32, %v60_v31  ;;  %v62_v40 = vld [vmem:[%s2930_s0 + $0x50] sm:$0xff] }
   0xd   :  { %v216_v36 = vpack.c.bf16 %v157_v34, %v156_v33  ;;  %v184_v37 = vld [vmem:[%s2931_s1 + $0x120] sm:$0xff]  ;;  %v185_v38 = vld [vmem:[%s2931_s1 + $0x128] sm:$0xff]  ;;  %v63_v41 = vld [vmem:[%s2930_s0 + $0x58] sm:$0xff] }
   0xe   :  { %v230_v39 = vpack.c.bf16 %v185_v38, %v184_v37  ;;  %v158_v42 = vld [vmem:[%s2931_s1 + $0x50] sm:$0xff]  ;;  %v159_v43 = vld [vmem:[%s2931_s1 + $0x58] sm:$0xff]  ;;  %v121_v44 = vpack.c.bf16 %v63_v41, %v62_v40  ;;  %v88_v46 = vld [vmem:[%s2930_s0 + $0x120] sm:$0xff] }
   0xf   :  { %v217_v45 = vpack.c.bf16 %v159_v43, %v158_v42  ;;  %v89_v47 = vld [vmem:[%s2930_s0 + $0x128] sm:$0xff]  ;;  %v186_v49 = vld [vmem:[%s2931_s1 + $0x130] sm:$0xff]  ;;  %v187_v50 = vld [vmem:[%s2931_s1 + $0x138] sm:$0xff] }
  0x10   :  { %1652 = vmatmul.msk.bf16.vlgmr.msra.gmra.mxu2 %vm249_vm2, %v230_v39  ;;  %v134_v48 = vpack.c.bf16 %v89_v47, %v88_v46  ;;  %v231_v51 = vpack.c.bf16 %v187_v50, %v186_v49  ;;  %v64_v52 = vld [vmem:[%s2930_s0 + $0x60] sm:$0xff]  ;;  %v65_v53 = vld [vmem:[%s2930_s0 + $0x68] sm:$0xff]  ;;  %v90_v58 = vld [vmem:[%s2930_s0 + $0x130] sm:$0xff] }
  0x11   :  { %v160_v54 = vld [vmem:[%s2931_s1 + $0x60] sm:$0xff]  ;;  %v161_v55 = vld [vmem:[%s2931_s1 + $0x68] sm:$0xff]  ;;  %v122_v56 = vpack.c.bf16 %v65_v53, %v64_v52  ;;  %v91_v59 = vld [vmem:[%s2930_s0 + $0x138] sm:$0xff] }
  0x12   :  { %1620 = vmatmul.msk.bf16.vlgmr.msra.gmra.mxu3 %vm249_vm2, %v134_v48  ;;  %v218_v57 = vpack.c.bf16 %v161_v55, %v160_v54  ;;  %v135_v60 = vpack.c.bf16 %v91_v59, %v90_v58  ;;  %v188_v61 = vld [vmem:[%s2931_s1 + $0x140] sm:$0xff]  ;;  %v189_v62 = vld [vmem:[%s2931_s1 + $0x148] sm:$0xff]  ;;  %v66_v63 = vld [vmem:[%s2930_s0 + $0x70] sm:$0xff] }
  0x13   :  { %v232_v0 = vpack.c.bf16 %v189_v62, %v188_v61  ;;  %v67_v1 = vld [vmem:[%s2930_s0 + $0x78] sm:$0xff]  ;;  %v162_v2 = vld [vmem:[%s2931_s1 + $0x70] sm:$0xff]  ;;  %v92_v6 = vld [vmem:[%s2930_s0 + $0x140] sm:$0xff] }
  0x14   :  { %v163_v3 = vld [vmem:[%s2931_s1 + $0x78] sm:$0xff]  ;;  %v123_v4 = vpack.c.bf16 %v67_v1, %v66_v63  ;;  %v93_v7 = vld [vmem:[%s2930_s0 + $0x148] sm:$0xff]  ;;  %v190_v9 = vld [vmem:[%s2931_s1 + $0x150] sm:$0xff] }
  0x15   :  { %v219_v5 = vpack.c.bf16 %v163_v3, %v162_v2  ;;  %v136_v8 = vpack.c.bf16 %v93_v7, %v92_v6  ;;  %v191_v10 = vld [vmem:[%s2931_s1 + $0x158] sm:$0xff]  ;;  %v68_v11 = vld [vmem:[%s2930_s0 + $0x80] sm:$0xff]  ;;  %v69_v13 = vld [vmem:[%s2930_s0 + $0x88] sm:$0xff] }
  0x16   :  { %v233_v12 = vpack.c.bf16 %v191_v10, %v190_v9  ;;  %v164_v14 = vld [vmem:[%s2931_s1 + $0x80] sm:$0xff]  ;;  %v165_v15 = vld [vmem:[%s2931_s1 + $0x88] sm:$0xff]  ;;  %v94_v22 = vld [vmem:[%s2930_s0 + $0x150] sm:$0xff] }
  0x17   :  { %v2087_v16 = vld [vmem:[%s2933_s3] ss:$0 sm:$0xff]  ;;  %v193_v34 = vld [vmem:[%s2931_s1 + $0x168] sm:$0xff]  ;;  %v70_v38 = vld [vmem:[%s2930_s0 + $0x90] sm:$0xff] }
  0x18   :  { %1603 = vmatmul.msk.bf16.gmra.mxu0 %vm249_vm2, %v117_v17  ;;  %v124_v17 = vpack.c.bf16 %v69_v13, %v68_v11  ;;  %v2092_v21 = vld [vmem:[%s2935_s5] ss:$0 sm:$0xff]  ;;  %v71_v40 = vld [vmem:[%s2930_s0 + $0x98] sm:$0xff]  ;;  %v166_v41 = vld [vmem:[%s2931_s1 + $0x90] sm:$0xff] }
  0x19   :  { %1635 = vmatmul.msk.bf16.gmra.mxu1 %vm249_vm2, %v213_v18  ;;  %v220_v18 = vpack.c.bf16 %v165_v15, %v164_v14  ;;  %v192_v33 = vld [vmem:[%s2931_s1 + $0x160] sm:$0xff]  ;;  %v167_v42 = vld [vmem:[%s2931_s1 + $0x98] sm:$0xff]  ;;  %v125_v48 = vpack.c.bf16 %v71_v40, %v70_v38  ;;  %v97_v55 = vld [vmem:[%s2930_s0 + $0x168] sm:$0xff] }
  0x1a   :  { %v234_v39 = vpack.c.bf16 %v193_v34, %v192_v33  ;;  %v221_v49 = vpack.c.bf16 %v167_v42, %v166_v41  ;;  %v96_v54 = vld [vmem:[%s2930_s0 + $0x160] sm:$0xff]  ;;  %v194_v3 = vld [vmem:[%s2931_s1 + $0x170] sm:$0xff]  ;;  %v73_v9 = vld [vmem:[%s2930_s0 + $0xa8] sm:$0xff] }
  0x1b   :  { %v138_v58 = vpack.c.bf16 %v97_v55, %v96_v54  ;;  %v72_v7 = vld [vmem:[%s2930_s0 + $0xa0] sm:$0xff]  ;;  %v169_v11 = vld [vmem:[%s2931_s1 + $0xa8] sm:$0xff]  ;;  %v74_v41 = vld [vmem:[%s2930_s0 + $0xb0] sm:$0xff] }
  0x1c   :  { %v168_v10 = vld [vmem:[%s2931_s1 + $0xa0] sm:$0xff]  ;;  %v197_v38 = vld [vmem:[%s2931_s1 + $0x188] sm:$0xff] }
  0x20   :  { %1653 = vmatmul.msk.bf16.gmra.mxu2 %vm249_vm2, %v231_v51 }
  0x22   :  { %1621 = vmatmul.msk.bf16.gmra.mxu3 %vm249_vm2, %v135_v60 }
  0x28   :  { %1604 = vmatmul.msk.bf16.gmra.mxu0 %vm249_vm2, %v118_v23  ;;  %v95_v23 = vld [vmem:[%s2930_s0 + $0x158] sm:$0xff] }
  0x29   :  { %1636 = vmatmul.msk.bf16.gmra.mxu1 %vm249_vm2, %v214_v24  ;;  %v137_v25 = vpack.c.bf16 %v95_v23, %v94_v22 }
  0x30   :  { %1654 = vmatmul.msk.bf16.gmra.mxu2 %vm249_vm2, %v232_v0 }
  0x32   :  { %1622 = vmatmul.msk.bf16.gmra.mxu3 %vm249_vm2, %v136_v8 }
  0x38   :  { %1605 = vmatmul.msk.bf16.gmra.mxu0 %vm249_vm2, %v119_v29 }
  0x39   :  { %1637 = vmatmul.msk.bf16.gmra.mxu1 %vm249_vm2, %v215_v30 }
  0x40   :  { %1655 = vmatmul.msk.bf16.gmra.mxu2 %vm249_vm2, %v233_v12 }
  0x42   :  { %1623 = vmatmul.msk.bf16.gmra.mxu3 %vm249_vm2, %v137_v25  ;;  %v99_v25 = vld [vmem:[%s2930_s0 + $0x178] sm:$0xff] }
  0x48   :  { %1606 = vmatmul.msk.bf16.gmra.mxu0 %vm249_vm2, %v120_v35 }
  0x49   :  { %1638 = vmatmul.msk.bf16.gmra.mxu1 %vm249_vm2, %v216_v36 }
  0x50   :  { %1656 = vmatmul.msk.bf16.gmra.mxu2 %vm249_vm2, %v234_v39 }
  0x52   :  { %1624 = vmatmul.msk.bf16.gmra.mxu3 %vm249_vm2, %v138_v58 }
  0x58   :  { %1607 = vmatmul.msk.bf16.gmra.mxu0 %vm249_vm2, %v121_v44 }
  0x59   :  { %1639 = vmatmul.msk.bf16.gmra.mxu1 %vm249_vm2, %v217_v45 }
  0x68   :  { %1608 = vmatmul.msk.bf16.gmra.mxu0 %vm249_vm2, %v122_v56 }
  0x69   :  { %1640 = vmatmul.msk.bf16.gmra.mxu1 %vm249_vm2, %v218_v57 }
  0x78   :  { %1609 = vmatmul.msk.bf16.gmra.mxu0 %vm249_vm2, %v123_v4  ;;  %v195_v4 = vld [vmem:[%s2931_s1 + $0x178] sm:$0xff] }
  0x79   :  { %1641 = vmatmul.msk.bf16.gmra.mxu1 %vm249_vm2, %v219_v5  ;;  %v235_v8 = vpack.c.bf16 %v195_v4, %v194_v3 }
  0x7b   :  { %1657 = vmatmul.msk.bf16.gmra.mxu2 %vm249_vm2, %v235_v8 }
  0x85   :  { %v362_v19 = vpop.f32.mrf.mxu0 }
  0x86   :  { %v699_v20 = vpop.f32.mrf.mxu1  ;;  %v363_v24 = vadd.f32 %v2087_v16, %v362_v19 }
  0x87   :  { %v700_v26 = vadd.f32 %v2092_v21, %v699_v20 }
  0x88   :  { %1610 = vmatmul.msk.bf16.gmra.mxu0 %vm249_vm2, %v124_v17  ;;  %v522_v27 = vmax.f32 %v363_v24, 0.0  ;;  %v126_v17 = vpack.c.bf16 %v73_v9, %v72_v7  ;;  %v98_v24 = vld [vmem:[%s2930_s0 + $0x170] sm:$0xff]  ;;  %v76_v9 = vld [vmem:[%s2930_s0 + $0xc0] sm:$0xff] }
  0x89   :  { %1642 = vmatmul.msk.bf16.gmra.mxu1 %vm249_vm2, %v220_v18  ;;  %v859_v30 = vmax.f32 %v700_v26, 0.0  ;;  %v222_v18 = vpack.c.bf16 %v169_v11, %v168_v10  ;;  %v77_v11 = vld [vmem:[%s2930_s0 + $0xc8] sm:$0xff] }
  0x8a   :  { %v924_v35 = vsel %vm923_vm3, %v522_v27, 0.0 }
  0x8b   :  { %v1065_v43 = vsel %vm1064_vm4, %v859_v30, 0.0 }
  0x8d   :  { %v364_v28 = vpop.f32.mrf.mxu0 }
  0x8e   :  { %v701_v29 = vpop.f32.mrf.mxu1  ;;  %v365_v31 = vadd.f32 %v2087_v16, %v364_v28  ;;  %v139_v28 = vpack.c.bf16 %v99_v25, %v98_v24 }
  0x8f   :  { %v702_v32 = vadd.f32 %v2092_v21, %v701_v29 }
  0x90   :  { %v523_v36 = vmax.f32 %v365_v31, 0.0  ;;  %1625 = vmatmul.msk.bf16.gmra.mxu3 %vm249_vm2, %v139_v28 }
  0x91   :  { %v860_v37 = vmax.f32 %v702_v32, 0.0 }
  0x92   :  { %v925_v44 = vsel %vm923_vm3, %v523_v36, 0.0 }
  0x93   :  { %v1066_v45 = vsel %vm1064_vm4, %v860_v37, 0.0  ;;  %v926_v46 = vadd.f32 %v925_v44, %v924_v35  ;;  %v196_v37 = vld [vmem:[%s2931_s1 + $0x180] sm:$0xff]  ;;  %v170_v44 = vld [vmem:[%s2931_s1 + $0xb0] sm:$0xff] }
  0x94   :  { %v1067_v47 = vadd.f32 %v1066_v45, %v1065_v43  ;;  %v236_v42 = vpack.c.bf16 %v197_v38, %v196_v37  ;;  %v75_v43 = vld [vmem:[%s2930_s0 + $0xb8] sm:$0xff] }
  0x95   :  { %v367_v50 = vpop.f32.mrf.mxu0  ;;  %v171_v45 = vld [vmem:[%s2931_s1 + $0xb8] sm:$0xff] }
  0x96   :  { %v704_v51 = vpop.f32.mrf.mxu1  ;;  %v368_v52 = vadd.f32 %v2087_v16, %v367_v50  ;;  %1658 = vmatmul.msk.bf16.gmra.mxu2 %vm249_vm2, %v236_v42  ;;  %v127_v50 = vpack.c.bf16 %v75_v43, %v74_v41  ;;  %v78_v43 = vld [vmem:[%s2930_s0 + $0xd0] sm:$0xff] }
  0x97   :  { %v705_v53 = vadd.f32 %v2092_v21, %v704_v51  ;;  %v223_v51 = vpack.c.bf16 %v171_v45, %v170_v44  ;;  %v79_v45 = vld [vmem:[%s2930_s0 + $0xd8] sm:$0xff] }
  0x98   :  { %v524_v56 = vmax.f32 %v368_v52, 0.0  ;;  %1611 = vmatmul.msk.bf16.gmra.mxu0 %vm249_vm2, %v125_v48 }
  0x99   :  { %v861_v57 = vmax.f32 %v705_v53, 0.0  ;;  %1643 = vmatmul.msk.bf16.gmra.mxu1 %vm249_vm2, %v221_v49 }
  0x9a   :  { %v927_v59 = vsel %vm923_vm3, %v524_v56, 0.0  ;;  %v100_v56 = vld [vmem:[%s2930_s0 + $0x180] sm:$0xff] }
  0x9b   :  { %v1068_v60 = vsel %vm1064_vm4, %v861_v57, 0.0  ;;  %v928_v61 = vadd.f32 %v927_v59, %v926_v46  ;;  %v101_v57 = vld [vmem:[%s2930_s0 + $0x188] sm:$0xff] }
  0x9c   :  { %v1069_v62 = vadd.f32 %v1068_v60, %v1067_v47  ;;  %v140_v60 = vpack.c.bf16 %v101_v57, %v100_v56 }
  0x9d   :  { %v369_v63 = vpop.f32.mrf.mxu0 }
  0x9e   :  { %v706_v0 = vpop.f32.mrf.mxu1  ;;  %v370_v1 = vadd.f32 %v2087_v16, %v369_v63 }
  0x9f   :  { %v707_v2 = vadd.f32 %v2092_v21, %v706_v0 }
  0xa0   :  { %v525_v5 = vmax.f32 %v370_v1, 0.0  ;;  %1626 = vmatmul.msk.bf16.gmra.mxu3 %vm249_vm2, %v140_v60  ;;  %v105_v60 = vld [vmem:[%s2930_s0 + $0x1a8] sm:$0xff] }
  0xa1   :  { %v862_v6 = vmax.f32 %v707_v2, 0.0 }
  0xa2   :  { %v929_v12 = vsel %vm923_vm3, %v525_v5, 0.0  ;;  %v198_v5 = vld [vmem:[%s2931_s1 + $0x190] sm:$0xff] }
  0xa3   :  { %v1070_v13 = vsel %vm1064_vm4, %v862_v6, 0.0  ;;  %v930_v14 = vadd.f32 %v929_v12, %v928_v61  ;;  %v199_v6 = vld [vmem:[%s2931_s1 + $0x198] sm:$0xff]  ;;  %v172_v12 = vld [vmem:[%s2931_s1 + $0xc0] sm:$0xff] }
  0xa4   :  { %v1071_v15 = vadd.f32 %v1070_v13, %v1069_v62  ;;  %v237_v10 = vpack.c.bf16 %v199_v6, %v198_v5  ;;  %v173_v13 = vld [vmem:[%s2931_s1 + $0xc8] sm:$0xff] }
  0xa5   :  { %v372_v19 = vpop.f32.mrf.mxu0 }
  0xa6   :  { %v709_v20 = vpop.f32.mrf.mxu1  ;;  %v373_v22 = vadd.f32 %v2087_v16, %v372_v19  ;;  %1659 = vmatmul.msk.bf16.gmra.mxu2 %vm249_vm2, %v237_v10  ;;  %v128_v19 = vpack.c.bf16 %v77_v11, %v76_v9  ;;  %v202_v10 = vld [vmem:[%s2931_s1 + $0x1b0] sm:$0xff]  ;;  %v203_v11 = vld [vmem:[%s2931_s1 + $0x1b8] sm:$0xff] }
  0xa7   :  { %v710_v23 = vadd.f32 %v2092_v21, %v709_v20  ;;  %v224_v20 = vpack.c.bf16 %v173_v13, %v172_v12 }
  0xa8   :  { %v526_v26 = vmax.f32 %v373_v22, 0.0  ;;  %1612 = vmatmul.msk.bf16.gmra.mxu0 %vm249_vm2, %v126_v17 }
  0xa9   :  { %v863_v27 = vmax.f32 %v710_v23, 0.0  ;;  %1644 = vmatmul.msk.bf16.gmra.mxu1 %vm249_vm2, %v222_v18 }
  0xaa   :  { %v931_v29 = vsel %vm923_vm3, %v526_v26, 0.0  ;;  %v102_v26 = vld [vmem:[%s2930_s0 + $0x190] sm:$0xff] }
  0xab   :  { %v1072_v30 = vsel %vm1064_vm4, %v863_v27, 0.0  ;;  %v932_v31 = vadd.f32 %v931_v29, %v930_v14  ;;  %v103_v27 = vld [vmem:[%s2930_s0 + $0x198] sm:$0xff] }
  0xac   :  { %v1073_v32 = vadd.f32 %v1072_v30, %v1071_v15  ;;  %v141_v30 = vpack.c.bf16 %v103_v27, %v102_v26 }
  0xad   :  { %v374_v33 = vpop.f32.mrf.mxu0 }
  0xae   :  { %v711_v34 = vpop.f32.mrf.mxu1  ;;  %v375_v35 = vadd.f32 %v2087_v16, %v374_v33 }
  0xaf   :  { %v712_v36 = vadd.f32 %v2092_v21, %v711_v34 }
  0xb0   :  { %v527_v39 = vmax.f32 %v375_v35, 0.0  ;;  %1627 = vmatmul.msk.bf16.gmra.mxu3 %vm249_vm2, %v141_v30 }
  0xb1   :  { %v864_v40 = vmax.f32 %v712_v36, 0.0 }
  0xb2   :  { %v933_v46 = vsel %vm923_vm3, %v527_v39, 0.0  ;;  %v200_v39 = vld [vmem:[%s2931_s1 + $0x1a0] sm:$0xff] }
  0xb3   :  { %v1074_v47 = vsel %vm1064_vm4, %v864_v40, 0.0  ;;  %v934_v48 = vadd.f32 %v933_v46, %v932_v31  ;;  %v201_v40 = vld [vmem:[%s2931_s1 + $0x1a8] sm:$0xff]  ;;  %v174_v46 = vld [vmem:[%s2931_s1 + $0xd0] sm:$0xff] }
  0xb4   :  { %v1075_v49 = vadd.f32 %v1074_v47, %v1073_v32  ;;  %v238_v44 = vpack.c.bf16 %v201_v40, %v200_v39  ;;  %v175_v47 = vld [vmem:[%s2931_s1 + $0xd8] sm:$0xff] }
  0xb5   :  { %v377_v52 = vpop.f32.mrf.mxu0 }
  0xb6   :  { %v714_v53 = vpop.f32.mrf.mxu1  ;;  %v378_v54 = vadd.f32 %v2087_v16, %v377_v52  ;;  %1660 = vmatmul.msk.bf16.gmra.mxu2 %vm249_vm2, %v238_v44  ;;  %v129_v52 = vpack.c.bf16 %v79_v45, %v78_v43 }
  0xb7   :  { %v715_v55 = vadd.f32 %v2092_v21, %v714_v53  ;;  %v225_v53 = vpack.c.bf16 %v175_v47, %v174_v46 }
  0xb8   :  { %v528_v58 = vmax.f32 %v378_v54, 0.0  ;;  %1613 = vmatmul.msk.bf16.gmra.mxu0 %vm249_vm2, %v127_v50 }
  0xb9   :  { %v865_v59 = vmax.f32 %v715_v55, 0.0  ;;  %1645 = vmatmul.msk.bf16.gmra.mxu1 %vm249_vm2, %v223_v51 }
  0xba   :  { %v935_v61 = vsel %vm923_vm3, %v528_v58, 0.0  ;;  %v2276_v58 = vpop.f32.mrf.mxu2 }
  0xbb   :  { %v1076_v62 = vsel %vm1064_vm4, %v865_v59, 0.0  ;;  %v936_v63 = vadd.f32 %v935_v61, %v934_v48  ;;  %v104_v59 = vld [vmem:[%s2930_s0 + $0x1a0] sm:$0xff] }
  0xbc   :  { %v1077_v0 = vadd.f32 %v1076_v62, %v1075_v49 }
  0xbd   :  { %v379_v1 = vpop.f32.mrf.mxu0 }
  0xbe   :  { %v716_v2 = vpop.f32.mrf.mxu1  ;;  %v380_v3 = vadd.f32 %v2087_v16, %v379_v1 }
  0xbf   :  { %v717_v4 = vadd.f32 %v2092_v21, %v716_v2 }
  0xc0   :  { %v529_v7 = vmax.f32 %v380_v3, 0.0 }
  0xc1   :  { %v866_v8 = vmax.f32 %v717_v4, 0.0 }
  0xc2   :  { %v937_v14 = vsel %vm923_vm3, %v529_v7, 0.0  ;;  %v2293_v9 = vpop.f32.mrf.mxu2 }
  0xc3   :  { %v1078_v15 = vsel %vm1064_vm4, %v866_v8, 0.0  ;;  %v938_v17 = vadd.f32 %v937_v14, %v936_v63  ;;  %v142_v63 = vpack.c.bf16 %v105_v60, %v104_v59  ;;  %v2291_v8 = vpop.f32.mrf.mxu3  ;;  %v80_v14 = vld [vmem:[%s2930_s0 + $0xe0] sm:$0xff] }
  0xc4   :  { %v1079_v18 = vadd.f32 %v1078_v15, %v1077_v0  ;;  %v239_v15 = vpack.c.bf16 %v203_v11, %v202_v10  ;;  %v109_v10 = vld [vmem:[%s2930_s0 + $0x1c8] sm:$0xff] }
  0xc5   :  { %v382_v22 = vpop.f32.mrf.mxu0  ;;  %1628 = vmatmul.msk.bf16.gmra.mxu3 %vm249_vm2, %v142_v63 }
  0xc6   :  { %v719_v23 = vpop.f32.mrf.mxu1  ;;  %v383_v24 = vadd.f32 %v2087_v16, %v382_v22  ;;  %1661 = vmatmul.msk.bf16.gmra.mxu2 %vm249_vm2, %v239_v15 }
  0xc7   :  { %v720_v25 = vadd.f32 %v2092_v21, %v719_v23 }
  0xc8   :  { %v530_v28 = vmax.f32 %v383_v24, 0.0  ;;  %1614 = vmatmul.msk.bf16.gmra.mxu0 %vm249_vm2, %v128_v19  ;;  %v177_v19 = vld [vmem:[%s2931_s1 + $0xe8] sm:$0xff] }
  0xc9   :  { %v867_v29 = vmax.f32 %v720_v25, 0.0  ;;  %1646 = vmatmul.msk.bf16.gmra.mxu1 %vm249_vm2, %v224_v20 }
  0xca   :  { %v939_v31 = vsel %vm923_vm3, %v530_v28, 0.0 }
  0xcb   :  { %v1080_v32 = vsel %vm1064_vm4, %v867_v29, 0.0  ;;  %v940_v33 = vadd.f32 %v939_v31, %v938_v17  ;;  %v81_v17 = vld [vmem:[%s2930_s0 + $0xe8] sm:$0xff]  ;;  %v2318_v31 = vpop.f32.mrf.mxu3 }
  0xcc   :  { %v1081_v34 = vadd.f32 %v1080_v32, %v1079_v18  ;;  %v176_v18 = vld [vmem:[%s2931_s1 + $0xe0] sm:$0xff]  ;;  %v130_v25 = vpack.c.bf16 %v81_v17, %v80_v14  ;;  %v2320_v32 = vpop.f32.mrf.mxu2 }
  0xcd   :  { %v384_v35 = vpop.f32.mrf.mxu0  ;;  %v226_v26 = vpack.c.bf16 %v177_v19, %v176_v18 }
  0xce   :  { %v721_v36 = vpop.f32.mrf.mxu1  ;;  %v385_v37 = vadd.f32 %v2087_v16, %v384_v35 }
  0xcf   :  { %v722_v38 = vadd.f32 %v2092_v21, %v721_v36 }
  0xd0   :  { %v531_v41 = vmax.f32 %v385_v37, 0.0 }
  0xd1   :  { %v868_v42 = vmax.f32 %v722_v38, 0.0 }
  0xd2   :  { %v941_v48 = vsel %vm923_vm3, %v531_v41, 0.0 }
  0xd3   :  { %v1082_v49 = vsel %vm1064_vm4, %v868_v42, 0.0  ;;  %v942_v50 = vadd.f32 %v941_v48, %v940_v33  ;;  %v106_v33 = vld [vmem:[%s2930_s0 + $0x1b0] sm:$0xff]  ;;  %v2338_v47 = vpop.f32.mrf.mxu3 }
  0xd4   :  { %v1083_v51 = vadd.f32 %v1082_v49, %v1081_v34  ;;  %v107_v34 = vld [vmem:[%s2930_s0 + $0x1b8] sm:$0xff]  ;;  %v1211_v42 = vld [vmem:[%s2937_s7 + $0x10] sm:$0xff]  ;;  %v2340_v48 = vpop.f32.mrf.mxu2  ;;  %v204_v49 = vld [vmem:[%s2931_s1 + $0x1c0] sm:$0xff] }
  0xd5   :  { %v387_v54 = vpop.f32.mrf.mxu0  ;;  %v143_v37 = vpack.c.bf16 %v107_v34, %v106_v33  ;;  %1228 = vmatpush.msrb.mxu2 %v1211_v42  ;;  %v85_v34 = vld [vmem:[%s2930_s0 + $0x108] sm:$0xff] }
  0xd6   :  { %v724_v55 = vpop.f32.mrf.mxu1  ;;  %v388_v56 = vadd.f32 %v2087_v16, %v387_v54 }
  0xd7   :  { %v725_v57 = vadd.f32 %v2092_v21, %v724_v55  ;;  %1629 = vmatmul.msk.bf16.gmra.mxu3 %vm249_vm2, %v143_v37  ;;  %v83_v55 = vld [vmem:[%s2930_s0 + $0xf8] sm:$0xff] }
  0xd8   :  { %v532_v61 = vmax.f32 %v388_v56, 0.0  ;;  %1615 = vmatmul.msk.bf16.gmra.mxu0 %vm249_vm2, %v129_v52  ;;  %v178_v56 = vld [vmem:[%s2931_s1 + $0xf0] sm:$0xff] }
  0xd9   :  { %v869_v62 = vmax.f32 %v725_v57, 0.0  ;;  %1647 = vmatmul.msk.bf16.gmra.mxu1 %vm249_vm2, %v225_v53  ;;  %v82_v53 = vld [vmem:[%s2930_s0 + $0xf0] sm:$0xff]  ;;  %v179_v57 = vld [vmem:[%s2931_s1 + $0xf8] sm:$0xff] }
  0xda   :  { %v943_v0 = vsel %vm923_vm3, %v532_v61, 0.0  ;;  %v131_v63 = vpack.c.bf16 %v83_v55, %v82_v53 }
  0xdb   :  { %v1084_v1 = vsel %vm1064_vm4, %v869_v62, 0.0  ;;  %v944_v2 = vadd.f32 %v943_v0, %v942_v50  ;;  %v205_v50 = vld [vmem:[%s2931_s1 + $0x1c8] sm:$0xff]  ;;  %v227_v0 = vpack.c.bf16 %v179_v57, %v178_v56 }
  0xdc   :  { %v1085_v3 = vadd.f32 %v1084_v1, %v1083_v51  ;;  %v240_v54 = vpack.c.bf16 %v205_v50, %v204_v49 }
  0xdd   :  { %v389_v4 = vpop.f32.mrf.mxu0 }
  0xde   :  { %v726_v5 = vpop.f32.mrf.mxu1  ;;  %v390_v6 = vadd.f32 %v2087_v16, %v389_v4  ;;  %1662 = vmatmul.msk.bf16.gmra.mxu2 %vm249_vm2, %v240_v54 }
  0xdf   :  { %v727_v7 = vadd.f32 %v2092_v21, %v726_v5  ;;  %v2365_v5 = vpop.f32.mrf.mxu3 }
  0xe0   :  { %v533_v12 = vmax.f32 %v390_v6, 0.0  ;;  %v2367_v6 = vpop.f32.mrf.mxu2 }
  0xe1   :  { %v870_v13 = vmax.f32 %v727_v7, 0.0  ;;  %v108_v7 = vld [vmem:[%s2930_s0 + $0x1c0] sm:$0xff] }
  0xe2   :  { %v945_v20 = vsel %vm923_vm3, %v533_v12, 0.0 }
  0xe3   :  { %v1086_v22 = vsel %vm1064_vm4, %v870_v13, 0.0  ;;  %v946_v23 = vadd.f32 %v945_v20, %v944_v2  ;;  %v144_v13 = vpack.c.bf16 %v109_v10, %v108_v7 }
  0xe4   :  { %v1087_v24 = vadd.f32 %v1086_v22, %v1085_v3 }
  0xe5   :  { %v392_v27 = vpop.f32.mrf.mxu0 }
  0xe6   :  { %v729_v28 = vpop.f32.mrf.mxu1  ;;  %v393_v29 = vadd.f32 %v2087_v16, %v392_v27  ;;  %v207_v27 = vld [vmem:[%s2931_s1 + $0x1d8] sm:$0xff] }
  0xe7   :  { %v730_v30 = vadd.f32 %v2092_v21, %v729_v28  ;;  %1630 = vmatmul.msk.bf16.gmra.mxu3 %vm249_vm2, %v144_v13  ;;  %v87_v13 = vld [vmem:[%s2930_s0 + $0x118] sm:$0xff] }
  0xe8   :  { %v534_v35 = vmax.f32 %v393_v29, 0.0  ;;  %1616 = vmatmul.msk.bf16.gmra.mxu0 %vm249_vm2, %v130_v25  ;;  %v2384_v25 = vpop.f32.mrf.mxu2 }
  0xe9   :  { %v871_v36 = vmax.f32 %v730_v30, 0.0  ;;  %1648 = vmatmul.msk.bf16.gmra.mxu1 %vm249_vm2, %v226_v26  ;;  %v206_v26 = vld [vmem:[%s2931_s1 + $0x1d0] sm:$0xff]  ;;  %v84_v30 = vld [vmem:[%s2930_s0 + $0x100] sm:$0xff] }
  0xea   :  { %v947_v38 = vsel %vm923_vm3, %v534_v35, 0.0  ;;  %v241_v33 = vpack.c.bf16 %v207_v27, %v206_v26  ;;  %v180_v35 = vld [vmem:[%s2931_s1 + $0x100] sm:$0xff] }
  0xeb   :  { %v1088_v39 = vsel %vm1064_vm4, %v871_v36, 0.0  ;;  %v948_v40 = vadd.f32 %v947_v38, %v946_v23  ;;  %v181_v36 = vld [vmem:[%s2931_s1 + $0x108] sm:$0xff] }
  0xec   :  { %v1089_v41 = vadd.f32 %v1088_v39, %v1087_v24  ;;  %v2382_v24 = vpop.f32.mrf.mxu3  ;;  %v228_v42 = vpack.c.bf16 %v181_v36, %v180_v35  ;;  %v113_v35 = vld [vmem:[%s2930_s0 + $0x1e8] sm:$0xff] }
  0xed   :  { %v394_v43 = vpop.f32.mrf.mxu0 }
  0xee   :  { %v731_v44 = vpop.f32.mrf.mxu1  ;;  %v395_v45 = vadd.f32 %v2087_v16, %v394_v43  ;;  %1663 = vmatmul.msk.bf16.gmra.mxu2 %vm249_vm2, %v241_v33 }
  0xef   :  { %v732_v46 = vadd.f32 %v2092_v21, %v731_v44 }
  0xf0   :  { %v535_v51 = vmax.f32 %v395_v45, 0.0  ;;  %v2411_v50 = vpop.f32.mrf.mxu2 }
  0xf1   :  { %v872_v52 = vmax.f32 %v732_v46, 0.0 }
  0xf2   :  { %v949_v59 = vsel %vm923_vm3, %v535_v51, 0.0  ;;  %v110_v51 = vld [vmem:[%s2930_s0 + $0x1d0] sm:$0xff] }
  0xf3   :  { %v1090_v60 = vsel %vm1064_vm4, %v872_v52, 0.0  ;;  %v950_v61 = vadd.f32 %v949_v59, %v948_v40  ;;  %v111_v52 = vld [vmem:[%s2930_s0 + $0x1d8] sm:$0xff] }
  0xf4   :  { %v1091_v62 = vadd.f32 %v1090_v60, %v1089_v41  ;;  %v132_v41 = vpack.c.bf16 %v85_v34, %v84_v30  ;;  %v2409_v49 = vpop.f32.mrf.mxu3  ;;  %v145_v55 = vpack.c.bf16 %v111_v52, %v110_v51  ;;  %v112_v34 = vld [vmem:[%s2930_s0 + $0x1e0] sm:$0xff] }
  0xf5   :  { %v397_v1 = vpop.f32.mrf.mxu0 }
  0xf6   :  { %v734_v2 = vpop.f32.mrf.mxu1  ;;  %v398_v3 = vadd.f32 %v2087_v16, %v397_v1 }
  0xf7   :  { %v735_v4 = vadd.f32 %v2092_v21, %v734_v2  ;;  %1631 = vmatmul.msk.bf16.gmra.mxu3 %vm249_vm2, %v145_v55 }
  0xf8   :  { %v536_v11 = vmax.f32 %v398_v3, 0.0  ;;  %1617 = vmatmul.msk.bf16.gmra.mxu0 %vm249_vm2, %v131_v63  ;;  %v2428_v2 = vpop.f32.mrf.mxu2  ;;  %v208_v3 = vld [vmem:[%s2931_s1 + $0x1e0] sm:$0xff] }
  0xf9   :  { %v873_v12 = vmax.f32 %v735_v4, 0.0  ;;  %1649 = vmatmul.msk.bf16.gmra.mxu1 %vm249_vm2, %v227_v0  ;;  %v209_v4 = vld [vmem:[%s2931_s1 + $0x1e8] sm:$0xff] }
  0xfa   :  { %v951_v14 = vsel %vm923_vm3, %v536_v11, 0.0  ;;  %v86_v11 = vld [vmem:[%s2930_s0 + $0x110] sm:$0xff] }
  0xfb   :  { %v1092_v15 = vsel %vm1064_vm4, %v873_v12, 0.0  ;;  %v952_v17 = vadd.f32 %v951_v14, %v950_v61  ;;  %v242_v12 = vpack.c.bf16 %v209_v4, %v208_v3  ;;  %v182_v14 = vld [vmem:[%s2931_s1 + $0x110] sm:$0xff] }
  0xfc   :  { %v1093_v18 = vadd.f32 %v1092_v15, %v1091_v62  ;;  %v2426_v1 = vpop.f32.mrf.mxu3  ;;  %v183_v15 = vld [vmem:[%s2931_s1 + $0x118] sm:$0xff] }
  0xfd   :  { %v399_v19 = vpop.f32.mrf.mxu0 }
  0xfe   :  { %v736_v20 = vpop.f32.mrf.mxu1  ;;  %v400_v22 = vadd.f32 %v2087_v16, %v399_v19  ;;  %1664 = vmatmul.msk.bf16.gmra.mxu2 %vm249_vm2, %v242_v12  ;;  %v115_v12 = vld [vmem:[%s2930_s0 + $0x1f8] sm:$0xff] }
  0xff   :  { %v737_v23 = vadd.f32 %v2092_v21, %v736_v20 }
 0x100   :  { %v537_v28 = vmax.f32 %v400_v22, 0.0  ;;  %v133_v22 = vpack.c.bf16 %v87_v13, %v86_v11  ;;  %v2455_v33 = vpop.f32.mrf.mxu2  ;;  %v114_v11 = vld [vmem:[%s2930_s0 + $0x1f0] sm:$0xff]  ;;  %s1823_s0 = smov [#allocation4]  }
 0x101   :  { %v874_v29 = vmax.f32 %v737_v23, 0.0  ;;  %v229_v23 = vpack.c.bf16 %v183_v15, %v182_v14  ;;  %v147_v15 = vpack.c.bf16 %v115_v12, %v114_v11  ;;  %s1586_s2 = sshll.u32 %s1823_s0, 4  ;;  %s1587_s2 = int_to_ptr.vmem [resolvable:$true] %s1586_s2 }
 0x102   :  { %v953_v37 = vsel %vm923_vm3, %v537_v28, 0.0 }
 0x103   :  { %v1094_v38 = vsel %vm1064_vm4, %v874_v29, 0.0  ;;  %v954_v39 = vadd.f32 %v953_v37, %v952_v17 }
 0x104   :  { %v1095_v40 = vadd.f32 %v1094_v38, %v1093_v18  ;;  %v2453_v30 = vpop.f32.mrf.mxu3  ;;  %v146_v38 = vpack.c.bf16 %v113_v35, %v112_v34 }
 0x105   :  { %v402_v43 = vpop.f32.mrf.mxu0 }
 0x106   :  { %v739_v44 = vpop.f32.mrf.mxu1  ;;  %v403_v45 = vadd.f32 %v2087_v16, %v402_v43 }
 0x107   :  { %v740_v46 = vadd.f32 %v2092_v21, %v739_v44  ;;  %1632 = vmatmul.msk.bf16.gmra.mxu3 %vm249_vm2, %v146_v38 }
 0x108   :  { %v538_v53 = vmax.f32 %v403_v45, 0.0  ;;  %1618 = vmatmul.msk.bf16.gmra.mxu0 %vm249_vm2, %v132_v41  ;;  %v2472_v52 = vpop.f32.mrf.mxu2 }
 0x109   :  { %v875_v54 = vmax.f32 %v740_v46, 0.0  ;;  %1650 = vmatmul.msk.bf16.gmra.mxu1 %vm249_vm2, %v228_v42 }
 0x10a   :  { %v955_v56 = vsel %vm923_vm3, %v538_v53, 0.0  ;;  %v210_v53 = vld [vmem:[%s2931_s1 + $0x1f0] sm:$0xff] }
 0x10b   :  { %v1096_v57 = vsel %vm1064_vm4, %v875_v54, 0.0  ;;  %v956_v59 = vadd.f32 %v955_v56, %v954_v39  ;;  %v211_v54 = vld [vmem:[%s2931_s1 + $0x1f8] sm:$0xff] }
 0x10c   :  { %v1097_v60 = vadd.f32 %v1096_v57, %v1095_v40  ;;  %v2470_v51 = vpop.f32.mrf.mxu3  ;;  %v243_v57 = vpack.c.bf16 %v211_v54, %v210_v53 }
 0x10d   :  { %v404_v61 = vpop.f32.mrf.mxu0 }
 0x10e   :  { %v741_v62 = vpop.f32.mrf.mxu1  ;;  %v405_v63 = vadd.f32 %v2087_v16, %v404_v61  ;;  %1665 = vmatmul.msk.bf16.gmra.mxu2 %vm249_vm2, %v243_v57 }
 0x10f   :  { %v742_v0 = vadd.f32 %v2092_v21, %v741_v62 }
 0x110   :  { %v539_v7 = vmax.f32 %v405_v63, 0.0 }
 0x111   :  { %v876_v10 = vmax.f32 %v742_v0, 0.0 }
 0x112   :  { %v957_v17 = vsel %vm923_vm3, %v539_v7, 0.0 }
 0x113   :  { %v1098_v18 = vsel %vm1064_vm4, %v876_v10, 0.0  ;;  %v958_v19 = vadd.f32 %v957_v17, %v956_v59  ;;  %v2487_v10 = vpop.f32.mrf.mxu2 }
 0x114   :  { %v1099_v20 = vadd.f32 %v1098_v18, %v1097_v60  ;;  %v2485_v7 = vpop.f32.mrf.mxu3 }
 0x115   :  { %v407_v26 = vpop.f32.mrf.mxu0 }
 0x116   :  { %v744_v27 = vpop.f32.mrf.mxu1  ;;  %v408_v28 = vadd.f32 %v2087_v16, %v407_v26 }
 0x117   :  { %v745_v29 = vadd.f32 %v2092_v21, %v744_v27  ;;  %1633 = vmatmul.msk.bf16.gmra.mxu3 %vm249_vm2, %v147_v15 }
 0x118   :  { %v540_v36 = vmax.f32 %v408_v28, 0.0  ;;  %1619 = vmatmul.msk.bf16.gmra.mxu0 %vm249_vm2, %v133_v22 }
 0x119   :  { %v877_v37 = vmax.f32 %v745_v29, 0.0  ;;  %1651 = vmatmul.msk.bf16.gmra.mxu1 %vm249_vm2, %v229_v23 }
 0x11a   :  { %v959_v39 = vsel %vm923_vm3, %v540_v36, 0.0 }
 0x11b   :  { %v1100_v40 = vsel %vm1064_vm4, %v877_v37, 0.0  ;;  %v960_v41 = vadd.f32 %v959_v39, %v958_v19  ;;  %v2502_v29 = vpop.f32.mrf.mxu2 }
 0x11c   :  { %v1101_v42 = vadd.f32 %v1100_v40, %v1099_v20  ;;  %v2500_v28 = vpop.f32.mrf.mxu3 }
 0x11d   :  { %v409_v43 = vpop.f32.mrf.mxu0 }
 0x11e   :  { %v746_v44 = vpop.f32.mrf.mxu1  ;;  %v410_v45 = vadd.f32 %v2087_v16, %v409_v43 }
 0x11f   :  { %v747_v46 = vadd.f32 %v2092_v21, %v746_v44 }
 0x120   :  { %v541_v55 = vmax.f32 %v410_v45, 0.0 }
 0x121   :  { %v878_v56 = vmax.f32 %v747_v46, 0.0 }
 0x122   :  { %v961_v59 = vsel %vm923_vm3, %v541_v55, 0.0 }
 0x123   :  { %v1102_v60 = vsel %vm1064_vm4, %v878_v56, 0.0  ;;  %v962_v61 = vadd.f32 %v961_v59, %v960_v41  ;;  %v2510_v53 = vpop.f32.mrf.mxu2  ;;  %v1210_v59 = vld [vmem:[%s2937_s7 + $0x8] sm:$0xff] }
 0x124   :  { %v1103_v62 = vadd.f32 %v1102_v60, %v1101_v42  ;;  %v2508_v44 = vpop.f32.mrf.mxu3  ;;  %1229 = vmatpush.msrb.mxu2 %v1210_v59 }
 0x125   :  { %v412_v63 = vpop.f32.mrf.mxu0 }
 0x126   :  { %v749_v0 = vpop.f32.mrf.mxu1  ;;  %v413_v3 = vadd.f32 %v2087_v16, %v412_v63 }
 0x127   :  { %v750_v4 = vadd.f32 %v2092_v21, %v749_v0 }
 0x128   :  { %v542_v13 = vmax.f32 %v413_v3, 0.0 }
 0x129   :  { %v879_v14 = vmax.f32 %v750_v4, 0.0 }
 0x12a   :  { %v963_v17 = vsel %vm923_vm3, %v542_v13, 0.0 }
 0x12b   :  { %v1104_v18 = vsel %vm1064_vm4, %v879_v14, 0.0  ;;  %v964_v19 = vadd.f32 %v963_v17, %v962_v61  ;;  %v2523_v13 = vpop.f32.mrf.mxu2 }
 0x12c   :  { %v1105_v20 = vadd.f32 %v1104_v18, %v1103_v62  ;;  %v2519_v0 = vpop.f32.mrf.mxu3 }
 0x12d   :  { %v414_v22 = vpop.f32.mrf.mxu0 }
 0x12e   :  { %v751_v23 = vpop.f32.mrf.mxu1  ;;  %v415_v26 = vadd.f32 %v2087_v16, %v414_v22 }
 0x12f   :  { %v752_v27 = vadd.f32 %v2092_v21, %v751_v23 }
 0x130   :  { %v543_v34 = vmax.f32 %v415_v26, 0.0 }
 0x131   :  { %v880_v35 = vmax.f32 %v752_v27, 0.0 }
 0x132   :  { %v965_v36 = vsel %vm923_vm3, %v543_v34, 0.0 }
 0x133   :  { %v1106_v37 = vsel %vm1064_vm4, %v880_v35, 0.0  ;;  %v966_v38 = vadd.f32 %v965_v36, %v964_v19 }
 0x134   :  { %v1107_v39 = vadd.f32 %v1106_v37, %v1105_v20  ;;  %v2527_v22 = vpop.f32.mrf.mxu3  ;;  %v2531_v37 = vpop.f32.mrf.mxu2 }
 0x135   :  { %v417_v40 = vpop.f32.mrf.mxu0 }
 0x136   :  { %v754_v41 = vpop.f32.mrf.mxu1  ;;  %v418_v42 = vadd.f32 %v2087_v16, %v417_v40 }
 0x137   :  { %v755_v43 = vadd.f32 %v2092_v21, %v754_v41 }
 0x138   :  { %v544_v45 = vmax.f32 %v418_v42, 0.0 }
 0x139   :  { %v881_v46 = vmax.f32 %v755_v43, 0.0 }
 0x13a   :  { %v967_v54 = vsel %vm923_vm3, %v544_v45, 0.0 }
 0x13b   :  { %v1108_v55 = vsel %vm1064_vm4, %v881_v46, 0.0  ;;  %v968_v56 = vadd.f32 %v967_v54, %v966_v38 }
 0x13c   :  { %v1109_v57 = vadd.f32 %v1108_v55, %v1107_v39  ;;  %v2535_v42 = vpop.f32.mrf.mxu3 }
 0x13d   :  { %v419_v60 = vpop.f32.mrf.mxu0 }
 0x13e   :  { %v756_v61 = vpop.f32.mrf.mxu1  ;;  %v420_v62 = vadd.f32 %v2087_v16, %v419_v60 }
 0x13f   :  { %v757_v63 = vadd.f32 %v2092_v21, %v756_v61 }
 0x140   :  { %v545_v3 = vmax.f32 %v420_v62, 0.0  ;;  %v2541_v62 = vpop.f32.mrf.mxu2 }
 0x141   :  { %v882_v4 = vmax.f32 %v757_v63, 0.0 }
 0x142   :  { %v969_v11 = vsel %vm923_vm3, %v545_v3, 0.0 }
 0x143   :  { %v1110_v12 = vsel %vm1064_vm4, %v882_v4, 0.0  ;;  %v970_v14 = vadd.f32 %v969_v11, %v968_v56 }
 0x144   :  { %v1111_v15 = vadd.f32 %v1110_v12, %v1109_v57  ;;  %v2543_v63 = vpop.f32.mrf.mxu3 }
 0x145   :  { %v422_v17 = vpop.f32.mrf.mxu0 }
 0x146   :  { %v759_v18 = vpop.f32.mrf.mxu1  ;;  %v423_v19 = vadd.f32 %v2087_v16, %v422_v17 }
 0x147   :  { %v760_v20 = vadd.f32 %v2092_v21, %v759_v18 }
 0x148   :  { %v546_v23 = vmax.f32 %v423_v19, 0.0 }
 0x149   :  { %v883_v26 = vmax.f32 %v760_v20, 0.0 }
 0x14a   :  { %v971_v27 = vsel %vm923_vm3, %v546_v23, 0.0 }
 0x14b   :  { %v1112_v34 = vsel %vm1064_vm4, %v883_v26, 0.0  ;;  %v972_v35 = vadd.f32 %v971_v27, %v970_v14 }
 0x14c   :  { %v1113_v36 = vadd.f32 %v1112_v34, %v1111_v15  ;;  %v2549_v23 = vpop.f32.mrf.mxu3  ;;  %v2551_v34 = vpop.f32.mrf.mxu2 }
 0x14d   :  { %v424_v38 = vpop.f32.mrf.mxu0 }
 0x14e   :  { %v761_v39 = vpop.f32.mrf.mxu1  ;;  %v425_v40 = vadd.f32 %v2087_v16, %v424_v38 }
 0x14f   :  { %v762_v41 = vadd.f32 %v2092_v21, %v761_v39 }
 0x150   :  { %v547_v43 = vmax.f32 %v425_v40, 0.0 }
 0x151   :  { %v884_v45 = vmax.f32 %v762_v41, 0.0 }
 0x152   :  { %v973_v46 = vsel %vm923_vm3, %v547_v43, 0.0 }
 0x153   :  { %v1114_v54 = vsel %vm1064_vm4, %v884_v45, 0.0  ;;  %v974_v55 = vadd.f32 %v973_v46, %v972_v35 }
 0x154   :  { %v1115_v56 = vadd.f32 %v1114_v54, %v1113_v36 }
 0x155   :  { %v427_v57 = vpop.f32.mrf.mxu0 }
 0x156   :  { %v764_v59 = vpop.f32.mrf.mxu1  ;;  %v428_v60 = vadd.f32 %v2087_v16, %v427_v57 }
 0x157   :  { %v765_v61 = vadd.f32 %v2092_v21, %v764_v59  ;;  %v2561_v59 = vpop.f32.mrf.mxu2 }
 0x158   :  { %v548_v3 = vmax.f32 %v428_v60, 0.0 }
 0x159   :  { %v885_v4 = vmax.f32 %v765_v61, 0.0 }
 0x15a   :  { %v975_v11 = vsel %vm923_vm3, %v548_v3, 0.0 }
 0x15b   :  { %v1116_v12 = vsel %vm1064_vm4, %v885_v4, 0.0  ;;  %v976_v14 = vadd.f32 %v975_v11, %v974_v55  ;;  %v2557_v55 = vpop.f32.mrf.mxu3 }
 0x15c   :  { %v1117_v15 = vadd.f32 %v1116_v12, %v1115_v56 }
 0x15d   :  { %v429_v17 = vpop.f32.mrf.mxu0 }
 0x15e   :  { %v766_v18 = vpop.f32.mrf.mxu1  ;;  %v430_v19 = vadd.f32 %v2087_v16, %v429_v17 }
 0x15f   :  { %v767_v20 = vadd.f32 %v2092_v21, %v766_v18 }
 0x160   :  { %v549_v26 = vmax.f32 %v430_v19, 0.0 }
 0x161   :  { %v886_v27 = vmax.f32 %v767_v20, 0.0 }
 0x162   :  { %v977_v35 = vsel %vm923_vm3, %v549_v26, 0.0 }
 0x163   :  { %v1118_v36 = vsel %vm1064_vm4, %v886_v27, 0.0  ;;  %v978_v38 = vadd.f32 %v977_v35, %v976_v14  ;;  %v2567_v19 = vpop.f32.mrf.mxu3  ;;  %v2569_v27 = vpop.f32.mrf.mxu2 }
 0x164   :  { %v1119_v39 = vadd.f32 %v1118_v36, %v1117_v15 }
 0x165   :  { %v432_v40 = vpop.f32.mrf.mxu0 }
 0x166   :  { %v769_v41 = vpop.f32.mrf.mxu1  ;;  %v433_v43 = vadd.f32 %v2087_v16, %v432_v40 }
 0x167   :  { %v770_v45 = vadd.f32 %v2092_v21, %v769_v41 }
 0x168   :  { %v550_v46 = vmax.f32 %v433_v43, 0.0 }
 0x169   :  { %v887_v54 = vmax.f32 %v770_v45, 0.0 }
 0x16a   :  { %v979_v56 = vsel %vm923_vm3, %v550_v46, 0.0 }
 0x16b   :  { %v1120_v57 = vsel %vm1064_vm4, %v887_v54, 0.0  ;;  %v980_v60 = vadd.f32 %v979_v56, %v978_v38  ;;  %v2575_v56 = vpop.f32.mrf.mxu3 }
 0x16c   :  { %v1121_v61 = vadd.f32 %v1120_v57, %v1119_v39 }
 0x16d   :  { %v434_v3 = vpop.f32.mrf.mxu0 }
 0x16e   :  { %v771_v4 = vpop.f32.mrf.mxu1  ;;  %v435_v11 = vadd.f32 %v2087_v16, %v434_v3 }
 0x16f   :  { %v772_v12 = vadd.f32 %v2092_v21, %v771_v4  ;;  %v2589_v4 = vpop.f32.mrf.mxu2 }
 0x170   :  { %v551_v14 = vmax.f32 %v435_v11, 0.0 }
 0x171   :  { %v888_v15 = vmax.f32 %v772_v12, 0.0 }
 0x172   :  { %v981_v17 = vsel %vm923_vm3, %v551_v14, 0.0 }
 0x173   :  { %v1122_v18 = vsel %vm1064_vm4, %v888_v15, 0.0  ;;  %v982_v20 = vadd.f32 %v981_v17, %v980_v60 }
 0x174   :  { %v1123_v26 = vadd.f32 %v1122_v18, %v1121_v61  ;;  %v2580_v61 = vld [vmem:[%s2933_s3] ss:$0 sm:$0xff] }
 0x175   :  { %v437_v35 = vpop.f32.mrf.mxu0 }
 0x176   :  { %v774_v36 = vpop.f32.mrf.mxu1  ;;  %v438_v38 = vadd.f32 %v2087_v16, %v437_v35  ;;  %v2597_v35 = vpop.f32.mrf.mxu3 }
 0x177   :  { %v775_v39 = vadd.f32 %v2092_v21, %v774_v36  ;;  %v2586_v21 = vld [vmem:[%s2935_s5] ss:$0 sm:$0xff]  ;;  %v2599_v36 = vpop.f32.mrf.mxu2 }
 0x178   :  { %v552_v40 = vmax.f32 %v438_v38, 0.0 }
 0x179   :  { %v889_v41 = vmax.f32 %v775_v39, 0.0 }
 0x17a   :  { %v983_v43 = vsel %vm923_vm3, %v552_v40, 0.0 }
 0x17b   :  { %v1124_v45 = vsel %vm1064_vm4, %v889_v41, 0.0  ;;  %v984_v46 = vadd.f32 %v983_v43, %v982_v20 }
 0x17c   :  { %v1125_v54 = vadd.f32 %v1124_v45, %v1123_v26 }
 0x17d   :  { %v439_v57 = vpop.f32.mrf.mxu0 }
 0x17e   :  { %v776_v60 = vpop.f32.mrf.mxu1  ;;  %v440_v16 = vadd.f32 %v2580_v61, %v439_v57  ;;  %v2603_v43 = vpop.f32.mrf.mxu3 }
 0x17f   :  { %v777_v3 = vadd.f32 %v2586_v21, %v776_v60  ;;  %2950 = vst [vmem:[#allocation10_spill] sm:$0xff] %v2603_v43  ;;  %v2605_v45 = vpop.f32.mrf.mxu2 }
 0x180   :  { %v553_v11 = vmax.f32 %v440_v16, 0.0  ;;  %2951 = vst [vmem:[#allocation11_spill] sm:$0xff] %v2605_v45 }
 0x181   :  { %v890_v12 = vmax.f32 %v777_v3, 0.0 }
 0x182   :  { %v985_v14 = vsel %vm923_vm3, %v553_v11, 0.0 }
 0x183   :  { %v1126_v15 = vsel %vm1064_vm4, %v890_v12, 0.0  ;;  %v2593_v17 = vadd.f32 %v985_v14, %v984_v46 }
 0x184   :  { %v2595_v18 = vadd.f32 %v1126_v15, %v1125_v54 }
 0x185   :  { %2948 = vst [vmem:[#allocation8_spill] sm:$0xff] %v2593_v17  ;;  %v442_v20 = vpop.f32.mrf.mxu0 }
 0x186   :  { %2949 = vst [vmem:[#allocation9_spill] sm:$0xff] %v2595_v18  ;;  %v779_v26 = vpop.f32.mrf.mxu1  ;;  %v443_v40 = vadd.f32 %v2580_v61, %v442_v20  ;;  %v2619_v17 = vpop.f32.mrf.mxu3 }
 0x187   :  { %v780_v3 = vadd.f32 %v2586_v21, %v779_v26  ;;  %v792_v26 = vadd.f32 %v2586_v21, %v2293_v9  ;;  %2952 = vst [vmem:[#allocation12_spill] sm:$0xff] %v2619_v17 }
 0x188   :  { %v554_v46 = vmax.f32 %v443_v40, 0.0  ;;  %v790_v40 = vadd.f32 %v2586_v21, %v2276_v58  ;;  %v455_v58 = vadd.f32 %v2580_v61, %v2318_v31  ;;  %v795_v31 = vadd.f32 %v2586_v21, %v2320_v32 }
 0x18a   :  { %v993_v14 = vsel %vm923_vm3, %v554_v46, 0.0  ;;  %v559_v43 = vmax.f32 %v455_v58, 0.0  ;;  %v897_v58 = vmax.f32 %v795_v31, 0.0 }
 0x18d   :  { %v444_v38 = vpop.f32.mrf.mxu0 }
 0x18e   :  { %v781_v39 = vpop.f32.mrf.mxu1  ;;  %v445_v41 = vadd.f32 %v2580_v61, %v444_v38 }
 0x18f   :  { %v782_v54 = vadd.f32 %v2586_v21, %v781_v39  ;;  %v453_v39 = vadd.f32 %v2580_v61, %v2291_v8 }
 0x190   :  { %v555_v57 = vmax.f32 %v445_v41, 0.0  ;;  %v891_v41 = vmax.f32 %v780_v3, 0.0  ;;  %v458_v3 = vadd.f32 %v2580_v61, %v2338_v47  ;;  %v460_v47 = vadd.f32 %v2580_v61, %v2365_v5 }
 0x191   :  { %v892_v20 = vmax.f32 %v782_v54, 0.0  ;;  %v2623_v54 = vpop.f32.mrf.mxu2  ;;  %v800_v5 = vadd.f32 %v2586_v21, %v2367_v6 }
 0x192   :  { %v994_v15 = vsel %vm923_vm3, %v555_v57, 0.0  ;;  %2953 = vst [vmem:[#allocation13_spill] sm:$0xff] %v2623_v54  ;;  %v1134_v9 = vsel %vm1064_vm4, %v891_v41, 0.0 }
 0x193   :  { %v1135_v46 = vsel %vm1064_vm4, %v892_v20, 0.0  ;;  %v558_v20 = vmax.f32 %v453_v39, 0.0  ;;  %v463_v39 = vadd.f32 %v2580_v61, %v2382_v24  ;;  %v802_v24 = vadd.f32 %v2586_v21, %v2384_v25 }
 0x194   :  { %v1136_v54 = vadd.f32 %v1135_v46, %v1134_v9  ;;  %v2652_v9 = vpop.f32.mrf.mxu3  ;;  %v1145_v25 = vsel %vm1064_vm4, %v897_v58, 0.0  ;;  %v810_v58 = vadd.f32 %v2586_v21, %v2455_v33  ;;  %v815_v33 = vadd.f32 %v2586_v21, %v2487_v10 }
 0x195   :  { %v447_v60 = vpop.f32.mrf.mxu0 }
 0x196   :  { %v784_v16 = vpop.f32.mrf.mxu1  ;;  %v448_v11 = vadd.f32 %v2580_v61, %v447_v60  ;;  %v995_v60 = vadd.f32 %v994_v15, %v993_v14 }
 0x197   :  { %v785_v12 = vadd.f32 %v2586_v21, %v784_v16  ;;  %v895_v16 = vmax.f32 %v790_v40, 0.0 }
 0x198   :  { %v556_v38 = vmax.f32 %v448_v11, 0.0 }
 0x199   :  { %v893_v18 = vmax.f32 %v785_v12, 0.0  ;;  %v1141_v41 = vsel %vm1064_vm4, %v895_v16, 0.0  ;;  %v1000_v16 = vsel %vm923_vm3, %v558_v20, 0.0  ;;  %v899_v20 = vmax.f32 %v800_v5, 0.0  ;;  %v2660_v31 = vpop.f32.mrf.mxu2 }
 0x19a   :  { %v996_v57 = vsel %vm923_vm3, %v556_v38, 0.0  ;;  %v896_v38 = vmax.f32 %v792_v26, 0.0 }
 0x19b   :  { %v1137_v12 = vsel %vm1064_vm4, %v893_v18, 0.0  ;;  %v997_v40 = vadd.f32 %v996_v57, %v995_v60  ;;  %v797_v18 = vadd.f32 %v2586_v21, %v2340_v48  ;;  %v561_v48 = vmax.f32 %v460_v47, 0.0 }
 0x19c   :  { %v1143_v60 = vsel %vm1064_vm4, %v896_v38, 0.0 }
 0x19d   :  { %v449_v8 = vpop.f32.mrf.mxu0  ;;  %v1006_v47 = vsel %vm923_vm3, %v561_v48, 0.0  ;;  %v475_v48 = vadd.f32 %v2580_v61, %v2485_v7 }
 0x19e   :  { %v786_v11 = vpop.f32.mrf.mxu1  ;;  %v450_v14 = vadd.f32 %v2580_v61, %v449_v8  ;;  %v1138_v8 = vadd.f32 %v1137_v12, %v1136_v54  ;;  %v465_v54 = vadd.f32 %v2580_v61, %v2409_v49  ;;  %v1002_v12 = vsel %vm923_vm3, %v559_v43, 0.0 }
 0x19f   :  { %v787_v15 = vadd.f32 %v2586_v21, %v786_v11  ;;  %v560_v11 = vmax.f32 %v458_v3, 0.0  ;;  %v898_v3 = vmax.f32 %v797_v18, 0.0  ;;  %v805_v49 = vadd.f32 %v2586_v21, %v2411_v50 }
 0x1a0   :  { %v557_v17 = vmax.f32 %v450_v14, 0.0  ;;  %v562_v14 = vmax.f32 %v463_v39, 0.0  ;;  %v470_v43 = vadd.f32 %v2580_v61, %v2453_v30 }
 0x1a1   :  { %v894_v45 = vmax.f32 %v787_v15, 0.0  ;;  %v1004_v6 = vsel %vm923_vm3, %v560_v11, 0.0  ;;  %v468_v15 = vadd.f32 %v2580_v61, %v2426_v1  ;;  %v1147_v18 = vsel %vm1064_vm4, %v898_v3, 0.0 }
 0x1a2   :  { %v998_v26 = vsel %vm923_vm3, %v557_v17, 0.0  ;;  %v1008_v39 = vsel %vm923_vm3, %v562_v14, 0.0  ;;  %v901_v5 = vmax.f32 %v805_v49, 0.0 }
 0x1a3   :  { %v1139_v32 = vsel %vm1064_vm4, %v894_v45, 0.0  ;;  %v999_v46 = vadd.f32 %v998_v26, %v997_v40  ;;  %v564_v50 = vmax.f32 %v468_v15, 0.0  ;;  %v807_v26 = vadd.f32 %v2586_v21, %v2428_v2  ;;  %v1208_v15 = vld [vmem:[%s2936_s6 + $0x18] sm:$0xff] }
 0x1a4   :  { %v1140_v57 = vadd.f32 %v1139_v32, %v1138_v8  ;;  %v900_v8 = vmax.f32 %v802_v24, 0.0  ;;  %v473_v32 = vadd.f32 %v2580_v61, %v2470_v51  ;;  %v812_v2 = vadd.f32 %v2586_v21, %v2472_v52  ;;  %v1209_v52 = vld [vmem:[%s2937_s7] sm:$0xff]  ;;  %1250 = vmatpush.msrb.mxu3 %v1208_v15 }
 0x1a5   :  { %v1001_v17 = vadd.f32 %v1000_v16, %v999_v46  ;;  %v565_v16 = vmax.f32 %v470_v43, 0.0  ;;  %v1012_v24 = vsel %vm923_vm3, %v564_v50, 0.0  ;;  %1230 = vmatpush.msrb.mxu2 %v1209_v52  ;;  %v2700_v43 = vpop.f32.mrf.mxu2  ;;  %v493_v15 = vadd.f32 %v2580_v61, %v2549_v23 }
 0x1a6   :  { %v1142_v45 = vadd.f32 %v1141_v41, %v1140_v57  ;;  %v563_v41 = vmax.f32 %v465_v54, 0.0  ;;  %v1151_v54 = vsel %vm1064_vm4, %v900_v8, 0.0  ;;  %v904_v10 = vmax.f32 %v812_v2, 0.0 }
 0x1a7   :  { %v1003_v38 = vadd.f32 %v1002_v12, %v1001_v17  ;;  %v902_v17 = vmax.f32 %v807_v26, 0.0  ;;  %v478_v12 = vadd.f32 %v2580_v61, %v2500_v28  ;;  %v1014_v49 = vsel %vm923_vm3, %v565_v16, 0.0 }
 0x1a8   :  { %v1144_v40 = vadd.f32 %v1143_v60, %v1142_v45  ;;  %v1149_v60 = vsel %vm1064_vm4, %v899_v20, 0.0  ;;  %v1010_v30 = vsel %vm923_vm3, %v563_v41, 0.0  ;;  %v566_v45 = vmax.f32 %v473_v32, 0.0  ;;  %v2693_v20 = vpop.f32.mrf.mxu3 }
 0x1a9   :  { %v1005_v1 = vadd.f32 %v1004_v6, %v1003_v38  ;;  %v1153_v6 = vsel %vm1064_vm4, %v901_v5, 0.0  ;;  %v903_v28 = vmax.f32 %v810_v58, 0.0  ;;  %v567_v38 = vmax.f32 %v475_v48, 0.0 }
 0x1aa   :  { %v1146_v11 = vadd.f32 %v1145_v25, %v1144_v40  ;;  %v480_v40 = vadd.f32 %v2580_v61, %v2508_v44  ;;  %v817_v25 = vadd.f32 %v2586_v21, %v2502_v29  ;;  %v1016_v8 = vsel %vm923_vm3, %v566_v45, 0.0 }
 0x1ab   :  { %v1007_v46 = vadd.f32 %v1006_v47, %v1005_v1  ;;  %v568_v1 = vmax.f32 %v478_v12, 0.0  ;;  %v820_v44 = vadd.f32 %v2586_v21, %v2510_v53  ;;  %v1157_v29 = vsel %vm1064_vm4, %v903_v28, 0.0 }
 0x1ac   :  { %v1148_v57 = vadd.f32 %v1147_v18, %v1146_v11  ;;  %v1155_v18 = vsel %vm1064_vm4, %v902_v17, 0.0  ;;  %v483_v11 = vadd.f32 %v2580_v61, %v2519_v0  ;;  %v1018_v32 = vsel %vm923_vm3, %v567_v38, 0.0 }
 0x1ad   :  { %v1009_v51 = vadd.f32 %v1008_v39, %v1007_v46  ;;  %v905_v39 = vmax.f32 %v815_v33, 0.0  ;;  %v485_v5 = vadd.f32 %v2580_v61, %v2527_v22  ;;  %v1159_v46 = vsel %vm1064_vm4, %v904_v10, 0.0  ;;  %v2735_v38 = vpop.f32.mrf.mxu2 }
 0x1ae   :  { %v1150_v3 = vadd.f32 %v1149_v60, %v1148_v57  ;;  %v569_v60 = vmax.f32 %v480_v40, 0.0  ;;  %v906_v57 = vmax.f32 %v817_v25, 0.0  ;;  %v1020_v0 = vsel %vm923_vm3, %v568_v1, 0.0 }
 0x1af   :  { %v1011_v7 = vadd.f32 %v1010_v30, %v1009_v51  ;;  %v570_v58 = vmax.f32 %v483_v11, 0.0  ;;  %v822_v53 = vadd.f32 %v2586_v21, %v2523_v13  ;;  %v488_v48 = vadd.f32 %v2580_v61, %v2535_v42 }
 0x1b0   :  { %v1152_v14 = vadd.f32 %v1151_v54, %v1150_v3  ;;  %v1161_v54 = vsel %vm1064_vm4, %v905_v39, 0.0  ;;  %v907_v2 = vmax.f32 %v820_v44, 0.0  ;;  %v1022_v22 = vsel %vm923_vm3, %v569_v60, 0.0  ;;  %v2727_v33 = vpop.f32.mrf.mxu3 }
 0x1b1   :  { %v1013_v47 = vadd.f32 %v1012_v24, %v1011_v7  ;;  %v571_v24 = vmax.f32 %v485_v5, 0.0  ;;  %v825_v17 = vadd.f32 %v2586_v21, %v2531_v37  ;;  %v490_v45 = vadd.f32 %v2580_v61, %v2543_v63 }
 0x1b2   :  { %v1154_v41 = vadd.f32 %v1153_v6, %v1152_v14  ;;  %v1163_v12 = vsel %vm1064_vm4, %v906_v57, 0.0  ;;  %v827_v13 = vadd.f32 %v2586_v21, %v2541_v62  ;;  %v1024_v7 = vsel %vm923_vm3, %v570_v58, 0.0 }
 0x1b3   :  { %v1015_v50 = vadd.f32 %v1014_v49, %v1013_v47  ;;  %v908_v14 = vmax.f32 %v822_v53, 0.0  ;;  %v572_v52 = vmax.f32 %v488_v48, 0.0  ;;  %v1165_v37 = vsel %vm1064_vm4, %v907_v2, 0.0 }
 0x1b4   :  { %v1156_v26 = vadd.f32 %v1155_v18, %v1154_v41  ;;  %v830_v63 = vadd.f32 %v2586_v21, %v2551_v34  ;;  %v1026_v62 = vsel %vm923_vm3, %v571_v24, 0.0  ;;  %v909_v40 = vmax.f32 %v825_v17, 0.0  ;;  %v2955_v17 = vld [vmem:[#allocation11_spill] sm:$0xff] }
 0x1b5   :  { %v1017_v30 = vadd.f32 %v1016_v8, %v1015_v50  ;;  %v573_v10 = vmax.f32 %v490_v45, 0.0  ;;  %v495_v25 = vadd.f32 %v2580_v61, %v2557_v55  ;;  %v910_v47 = vmax.f32 %v827_v13, 0.0 }
 0x1b6   :  { %v1158_v16 = vadd.f32 %v1157_v29, %v1156_v26  ;;  %v832_v23 = vadd.f32 %v2586_v21, %v2561_v59  ;;  %v1167_v8 = vsel %vm1064_vm4, %v908_v14, 0.0  ;;  %v1028_v34 = vsel %vm923_vm3, %v572_v52, 0.0 }
 0x1b7   :  { %v1019_v51 = vadd.f32 %v1018_v32, %v1017_v30  ;;  %v574_v1 = vmax.f32 %v493_v15, 0.0  ;;  %v498_v11 = vadd.f32 %v2580_v61, %v2567_v19  ;;  %v911_v39 = vmax.f32 %v830_v63, 0.0  ;;  %v2957_v63 = vld [vmem:[#allocation13_spill] sm:$0xff] }
 0x1b8   :  { %v1160_v3 = vadd.f32 %v1159_v46, %v1158_v16  ;;  %v835_v44 = vadd.f32 %v2586_v21, %v2569_v27  ;;  %v1169_v26 = vsel %vm1064_vm4, %v909_v40, 0.0  ;;  %v1030_v59 = vsel %vm923_vm3, %v573_v10, 0.0 }
 0x1b9   :  { %v1021_v42 = vadd.f32 %v1020_v0, %v1019_v51  ;;  %v575_v29 = vmax.f32 %v495_v25, 0.0  ;;  %v500_v32 = vadd.f32 %v2580_v61, %v2575_v56  ;;  %v1171_v60 = vsel %vm1064_vm4, %v910_v47, 0.0  ;;  %v517_v56 = vpop.f32.mrf.mxu3  ;;  %v1205_v47 = vld [vmem:[%s2936_s6] sm:$0xff] }
 0x1ba   :  { %v1162_v6 = vadd.f32 %v1161_v54, %v1160_v3  ;;  %v912_v5 = vmax.f32 %v832_v23, 0.0  ;;  %v1032_v19 = vsel %vm923_vm3, %v574_v1, 0.0  ;;  %v576_v30 = vmax.f32 %v498_v11, 0.0  ;;  %v2954_v3 = vld [vmem:[#allocation10_spill] sm:$0xff] }
 0x1bb   :  { %v1023_v49 = vadd.f32 %v1022_v22, %v1021_v42  ;;  %v837_v27 = vadd.f32 %v2586_v21, %v2589_v4  ;;  %v503_v16 = vadd.f32 %v2580_v61, %v2597_v35  ;;  %v1173_v0 = vsel %vm1064_vm4, %v911_v39, 0.0 }
 0x1bc   :  { %v1164_v28 = vadd.f32 %v1163_v12, %v1162_v6  ;;  %v913_v58 = vmax.f32 %v835_v44, 0.0  ;;  %v1034_v54 = vsel %vm923_vm3, %v575_v29, 0.0  ;;  %v577_v2 = vmax.f32 %v500_v32, 0.0  ;;  %v854_v12 = vpop.f32.mrf.mxu2 }
 0x1bd   :  { %v1025_v41 = vadd.f32 %v1024_v7, %v1023_v49  ;;  %v840_v51 = vadd.f32 %v2586_v21, %v2599_v36  ;;  %v505_v22 = vadd.f32 %v2580_v61, %v2954_v3  ;;  %v1175_v4 = vsel %vm1064_vm4, %v912_v5, 0.0  ;;  %v2956_v7 = vld [vmem:[#allocation12_spill] sm:$0xff]  ;;  %v1207_v36 = vld [vmem:[%s2936_s6 + $0x10] sm:$0xff] }
 0x1be   :  { %v1166_v18 = vadd.f32 %v1165_v37, %v1164_v28  ;;  %v842_v35 = vadd.f32 %v2586_v21, %v2955_v17  ;;  %v1036_v13 = vsel %vm923_vm3, %v576_v30, 0.0  ;;  %v914_v42 = vmax.f32 %v837_v27, 0.0  ;;  %1251 = vmatpush.msrb.mxu3 %v1207_v36  ;;  %v1206_v28 = vld [vmem:[%s2936_s6 + $0x8] sm:$0xff] }
 0x1bf   :  { %v1027_v50 = vadd.f32 %v1026_v62, %v1025_v41  ;;  %v578_v6 = vmax.f32 %v503_v16, 0.0  ;;  %v508_v14 = vadd.f32 %v2580_v61, %v2956_v7  ;;  %v1177_v52 = vsel %vm1064_vm4, %v913_v58, 0.0 }
 0x1c0   :  { %v1168_v55 = vadd.f32 %v1167_v8, %v1166_v18  ;;  %v845_v49 = vadd.f32 %v2586_v21, %v2957_v63  ;;  %v1038_v62 = vsel %vm923_vm3, %v577_v2, 0.0  ;;  %v915_v40 = vmax.f32 %v840_v51, 0.0  ;;  %1252 = vmatpush.msrb.mxu3 %v1206_v28 }
 0x1c1   :  { %v1029_v46 = vadd.f32 %v1028_v34, %v1027_v50  ;;  %v579_v10 = vmax.f32 %v505_v22, 0.0  ;;  %v510_v25 = vadd.f32 %v2580_v61, %v2652_v9  ;;  %v916_v41 = vmax.f32 %v842_v35, 0.0 }
 0x1c2   :  { %v1170_v57 = vadd.f32 %v1169_v26, %v1168_v55  ;;  %v847_v8 = vadd.f32 %v2586_v21, %v2660_v31  ;;  %v1179_v34 = vsel %vm1064_vm4, %v914_v42, 0.0  ;;  %v1040_v1 = vsel %vm923_vm3, %v578_v6, 0.0  ;;  %1253 = vmatpush.msrb.mxu3 %v1205_v47  ;;  %v1731_v31 = vld [vmem:[%s2940_s10 + $0x8] sm:$0xff] }
 0x1c3   :  { %v1031_v53 = vadd.f32 %v1030_v59, %v1029_v46  ;;  %v580_v11 = vmax.f32 %v508_v14, 0.0  ;;  %v513_v39 = vadd.f32 %v2580_v61, %v2693_v20  ;;  %v917_v50 = vmax.f32 %v845_v49, 0.0  ;;  %1316 = vmatpush.bf16.msra.mxu2 %v1731_v31  ;;  %v2959_v42 = vld [vmem:[#allocation9_spill] sm:$0xff] }
 0x1c4   :  { %v1172_v48 = vadd.f32 %v1171_v60, %v1170_v57  ;;  %v850_v55 = vadd.f32 %v2586_v21, %v2700_v43  ;;  %v1181_v26 = vsel %vm1064_vm4, %v915_v40, 0.0  ;;  %v1042_v59 = vsel %vm923_vm3, %v579_v10, 0.0  ;;  %v519_v57 = vpop.f32.mrf.mxu3  ;;  %v1730_v43 = vld [vmem:[%s2940_s10] sm:$0xff] }
 0x1c5   :  { %v1033_v24 = vadd.f32 %v1032_v19, %v1031_v53  ;;  %v581_v29 = vmax.f32 %v510_v25, 0.0  ;;  %v515_v32 = vadd.f32 %v2580_v61, %v2727_v33  ;;  %v1183_v5 = vsel %vm1064_vm4, %v916_v41, 0.0 }
 0x1c6   :  { %v1174_v45 = vadd.f32 %v1173_v0, %v1172_v48  ;;  %v918_v46 = vmax.f32 %v847_v8, 0.0  ;;  %v1044_v19 = vsel %vm923_vm3, %v580_v11, 0.0  ;;  %v582_v30 = vmax.f32 %v513_v39, 0.0  ;;  %v856_v48 = vpop.f32.mrf.mxu2 }
 0x1c7   :  { %v1035_v15 = vadd.f32 %v1034_v54, %v1033_v24  ;;  %v852_v27 = vadd.f32 %v2586_v21, %v2735_v38  ;;  %v518_v16 = vadd.f32 %v2580_v61, %v517_v56  ;;  %v1185_v58 = vsel %vm1064_vm4, %v917_v50, 0.0  ;;  %1317 = vmatpush.bf16.msra.mxu2 %v1730_v43 }
 0x1c8   :  { %v1176_v37 = vadd.f32 %v1175_v4, %v1174_v45  ;;  %v919_v53 = vmax.f32 %v850_v55, 0.0  ;;  %v1046_v54 = vsel %vm923_vm3, %v581_v29, 0.0  ;;  %v583_v2 = vmax.f32 %v515_v32, 0.0  ;;  %v2958_v45 = vld [vmem:[#allocation8_spill] sm:$0xff] }
 0x1c9   :  { %v1037_v23 = vadd.f32 %v1036_v13, %v1035_v15  ;;  %v855_v51 = vadd.f32 %v2586_v21, %v854_v12  ;;  %v520_v3 = vadd.f32 %v2580_v61, %v519_v57  ;;  %v1187_v24 = vsel %vm1064_vm4, %v918_v46, 0.0 }
 0x1ca   :  { %v1178_v18 = vadd.f32 %v1177_v52, %v1176_v37  ;;  %v1048_v38 = vsel %vm923_vm3, %v582_v30, 0.0  ;;  %v920_v56 = vmax.f32 %v852_v27, 0.0  ;;  %v584_v17 = vmax.f32 %v518_v16, 0.0 }
 0x1cb   :  { %v1039_v9 = vadd.f32 %v1038_v62, %v1037_v23  ;;  %v857_v35 = vadd.f32 %v2586_v21, %v856_v48  ;;  %v987_v13 = vrot.slane %v2958_v45, 4  ;;  %v1128_v6 = vrot.slane %v2959_v42, 4 }
 0x1cc   :  { %v1180_v44 = vadd.f32 %v1179_v34, %v1178_v18  ;;  %v1189_v12 = vsel %vm1064_vm4, %v919_v53, 0.0  ;;  %v1050_v61 = vsel %vm923_vm3, %v583_v2, 0.0  ;;  %v921_v36 = vmax.f32 %v855_v51, 0.0  ;;  %v1265_v53 = vld [vmem:[%s2939_s9 + $0x8] sm:$0xff]  ;;  %v1732_v2 = vld [vmem:[%s2940_s10 + $0x10] sm:$0xff] }
 0x1cd   :  { %v1041_v20 = vadd.f32 %v1040_v1, %v1039_v9  ;;  %v585_v52 = vmax.f32 %v520_v3, 0.0  ;;  %v1191_v63 = vsel %vm1064_vm4, %v920_v56, 0.0  ;;  %v1052_v49 = vsel %vm923_vm3, %v584_v17, 0.0  ;;  %v1750_v51 = vld [vmem:[%s2938_s8] ss:$0 sm:$0xff] }
 0x1ce   :  { %v1182_v60 = vadd.f32 %v1181_v26, %v1180_v44  ;;  %v922_v28 = vmax.f32 %v857_v35, 0.0  ;;  %v988_v21 = vadd.f32 %v987_v13, %v2958_v45  ;;  %v1129_v62 = vadd.f32 %v1128_v6, %v2959_v42  ;;  %v1745_v56 = vld [vmem:[%s2941_s11] ss:$0 sm:$0xff] }
 0x1cf   :  { %v1043_v0 = vadd.f32 %v1042_v59, %v1041_v20  ;;  %v1193_v25 = vsel %vm1064_vm4, %v921_v36, 0.0  ;;  %v1054_v47 = vsel %vm923_vm3, %v585_v52, 0.0 }
 0x1d0   :  { %v1184_v33 = vadd.f32 %v1183_v5, %v1182_v60  ;;  %v1195_v18 = vsel %vm1064_vm4, %v922_v28, 0.0  ;;  %v989_v8 = vrot.slane %v988_v21, 2  ;;  %v1130_v34 = vrot.slane %v1129_v62, 2  ;;  %v1737_v28 = vld [vmem:[%s2940_s10 + $0x38] sm:$0xff] }
 0x1d1   :  { %v1045_v4 = vadd.f32 %v1044_v19, %v1043_v0 }
 0x1d2   :  { %v1186_v22 = vadd.f32 %v1185_v58, %v1184_v33  ;;  %v990_v44 = vadd.f32 %v989_v8, %v988_v21  ;;  %v1131_v50 = vadd.f32 %v1130_v34, %v1129_v62  ;;  %v1264_v58 = vld [vmem:[%s2939_s9] sm:$0xff]  ;;  %v1273_v62 = vsel %vm923_vm3, %v1265_v53, 0.0  ;;  %v1708_v8 = vld [vmem:[%s2942_s12 + $0x58] sm:$0xff]  ;;  %v1707_v34 = vld [vmem:[%s2942_s12 + $0x50] sm:$0xff] }
 0x1d3   :  { %v1047_v14 = vadd.f32 %v1046_v54, %v1045_v4  ;;  %v1286_v48 = vpack.c.bf16 %v1265_v53, %v1264_v58  ;;  %v1733_v54 = vld [vmem:[%s2940_s10 + $0x18] sm:$0xff]  ;;  %v1266_v21 = vsel %vm923_vm3, %v1264_v58, 0.0 }
 0x1d4   :  { %v1188_v7 = vadd.f32 %v1187_v24, %v1186_v22  ;;  %v991_v29 = vrot.slane %v990_v44, 1  ;;  %v1132_v32 = vrot.slane %v1131_v50, 1  ;;  %1358 = vmatpush.bf16.msra.mxu3 %v1733_v54 }
 0x1d5   :  { %v1049_v37 = vadd.f32 %v1048_v38, %v1047_v14  ;;  %v1734_v14 = vld [vmem:[%s2940_s10 + $0x20] sm:$0xff] }
 0x1d6   :  { %v1190_v15 = vadd.f32 %v1189_v12, %v1188_v7  ;;  %v992_v57 = vadd.f32 %v991_v29, %v990_v44  ;;  %v1133_v43 = vadd.f32 %v1132_v32, %v1131_v50  ;;  %v1735_v7 = vld [vmem:[%s2940_s10 + $0x28] sm:$0xff]  ;;  %v1705_v44 = vld [vmem:[%s2942_s12 + $0x40] sm:$0xff] }
 0x1d7   :  { %v1051_v10 = vadd.f32 %v1050_v61, %v1049_v37  ;;  %v1746_v61 = vld [vmem:[%s2941_s11 + $0x1] ss:$0 sm:$0xff]  ;;  %v1283_v32 = vld [vmem:[%s2942_s12 + $0x8] sm:$0xff] }
 0x1d8   :  { %v1192_v40 = vadd.f32 %v1191_v63, %v1190_v15  ;;  %1359 = vmatpush.bf16.msra.mxu3 %v1732_v2 }
 0x1d9   :  { %v1053_v41 = vadd.f32 %v1052_v49, %v1051_v10  ;;  %v1267_v10 = vrot.slane %v1266_v21, 4 }
 0x1da   :  { %v1194_v23 = vadd.f32 %v1193_v25, %v1192_v40  ;;  %v1736_v40 = vld [vmem:[%s2940_s10 + $0x30] sm:$0xff]  ;;  %v1274_v25 = vrot.slane %v1273_v62, 4 }
 0x1db   :  { %v1055_v11 = vadd.f32 %v1054_v47, %v1053_v41  ;;  %v1268_v47 = vadd.f32 %v1267_v10, %v1266_v21 }
 0x1dc   :  { %v1196_v1 = vadd.f32 %v1195_v18, %v1194_v23  ;;  %v1275_v23 = vadd.f32 %v1274_v25, %v1273_v62 }
 0x1dd   :  { %v1056_v9 = vrot.slane %v1055_v11, 4  ;;  %v1269_v41 = vrot.slane %v1268_v47, 2 }
 0x1de   :  { %v1197_v39 = vrot.slane %v1196_v1, 4  ;;  %v1276_v18 = vrot.slane %v1275_v23, 2 }
 0x1df   :  { %v1057_v31 = vadd.f32 %v1056_v9, %v1055_v11  ;;  %v1270_v11 = vadd.f32 %v1269_v41, %v1268_v47  ;;  %v1706_v9 = vld [vmem:[%s2942_s12 + $0x48] sm:$0xff] }
 0x1e0   :  { %v1198_v55 = vadd.f32 %v1197_v39, %v1196_v1  ;;  %v1747_v1 = vld [vmem:[%s2941_s11 + $0x2] ss:$0 sm:$0xff]  ;;  %v1277_v39 = vadd.f32 %v1276_v18, %v1275_v23 }
 0x1e1   :  { %v1058_v59 = vrot.slane %v1057_v31, 2 }
 0x1e2   :  { %v1199_v26 = vrot.slane %v1198_v55, 2  ;;  %v1278_v29 = vrot.slane %v1277_v39, 1 }
 0x1e3   :  { %v1059_v60 = vadd.f32 %v1058_v59, %v1057_v31  ;;  %v1285_v31 = vld [vmem:[%s2942_s12 + $0x18] sm:$0xff]  ;;  %v1271_v59 = vrot.slane %v1270_v11, 1 }
 0x1e4   :  { %v1200_v20 = vadd.f32 %v1199_v26, %v1198_v55  ;;  %v1284_v26 = vld [vmem:[%s2942_s12 + $0x10] sm:$0xff] }
 0x1e5   :  { %v1060_v46 = vrot.slane %v1059_v60, 1 }
 0x1e6   :  { %v1201_v5 = vrot.slane %v1200_v20, 1 }
 0x1e7   :  { %v1061_v30 = vadd.f32 %v1060_v46, %v1059_v60  ;;  %v1279_v60 = vadd.f32 %v1278_v29, %v1277_v39 }
 0x1e8   :  { %v1202_v19 = vadd.f32 %v1201_v5, %v1200_v20  ;;  %v1272_v20 = vadd.f32 %v1271_v59, %v1270_v11  ;;  %v1282_v5 = vld [vmem:[%s2942_s12] sm:$0xff] }
 0x1e9   :  { %v1062_v16 = vsel %vm346_vm0, %v992_v57, %v1061_v30 }
 0x1ea   :  { %v1203_v27 = vsel %vm346_vm0, %v1133_v43, %v1202_v19  ;;  %v1063_v0 = vmul.f32 0.00390625, %v1062_v16  ;;  %v1280_v46 = vsel %vm346_vm0, %v1272_v20, %v1279_v60 }
 0x1eb   :  { %v1204_v33 = vmul.f32 0.00390625, %v1203_v27 }
 0x1ec   :  { %1667 = vmatmul.msk.f32.vlgmr.msrb.gmra.mxu3 %vm923_vm3, %v1063_v0 }
 0x1ed   :  { %1666 = vmatmul.msk.f32.vlgmr.msrb.gmra.mxu2 %vm1064_vm4, %v1204_v33  ;;  %1446 = vmatpush.msrb.mxu3 %v1708_v8 }
 0x1ee   :  { %1400 = vmatpush.bf16.msrb.mxu2 %v1735_v7  ;;  %v1725_v7 = vld [vmem:[%s2942_s12 + $0x20] sm:$0xff] }
 0x1ef   :  { %1447 = vmatpush.msrb.mxu3 %v1707_v34 }
 0x1f1   :  { %1448 = vmatpush.msrb.mxu3 %v1706_v9 }
 0x1f2   :  { %1401 = vmatpush.bf16.msrb.mxu2 %v1734_v14 }
 0x1f3   :  { %1449 = vmatpush.msrb.mxu3 %v1705_v44  ;;  %v1749_v44 = vld [vmem:[%s2943_s13] ss:$0 sm:$0xff] }
 0x1f5   :  { %1676 = vmatmul.msk.bf16.vlgmr.msra.gmra.mxu2 %vm923_vm3, %v1286_v48 }
 0x1f6   :  { %1509 = vmatpush.bf16.msra.mxu2 %v1737_v28 }
 0x1fa   :  { %1510 = vmatpush.bf16.msra.mxu2 %v1736_v40 }
 0x26f   :  { %v1255_v22 = vpop.f32.mrf.mxu3 }
 0x270   :  { %v1232_v3 = vpop.f32.mrf.mxu2 }
 0x271   :  { %v1256_v4 = vadd.f32 %v1255_v22, %v1232_v3 }
 0x273   :  { %v1262_v24 = vadd.f32 %v1750_v51, %v1256_v4 }
 0x275   :  { %1263 = vst [vmem:[#allocation2] sm:$0x3] %v1262_v24 }
 0x278   :  { %v1319_v38 = vpop.f32.mrf.mxu2 }
 0x279   :  { %v1320_v17 = vadd.f32 %v1745_v56, %v1319_v38 }
 0x27b   :  { %1751 = vtanh.f32 %v1320_v17 }
 0x280   :  { %v1321_v35 = vpop.f32.mrf.mxu2 }
 0x281   :  { %v1322_v45 = vadd.f32 %v1745_v56, %v1321_v35  ;;  %v1752_v13 = vpop.eup %1751  ;;  %v1281_v35 = vmul.f32 0.125, %v1280_v46 }
 0x283   :  { %1753 = vtanh.f32 %v1322_v45  ;;  %v1728_v45 = vld [vmem:[%s2942_s12 + $0x38] sm:$0xff] }
 0x289   :  { %v1754_v42 = vpop.eup %1753 }
 0x28a   :  { %v1326_v6 = vpack.c.bf16 %v1754_v42, %v1752_v13  ;;  %v1727_v13 = vld [vmem:[%s2942_s12 + $0x30] sm:$0xff]  ;;  %v1748_v42 = vld [vmem:[%s2941_s11 + $0x3] ss:$0 sm:$0xff]  ;;  %s1822_s11 = smov [#allocation2]  }
 0x28c   :  { %1690 = vmatmul.msk.bf16.vlgmr.msra.gmra.mxu3 %vm923_vm3, %v1326_v6  ;;  %v1726_v6 = vld [vmem:[%s2942_s12 + $0x28] sm:$0xff]  ;;  %s1575_s12 = sshll.u32 %s1822_s11, 4  ;;  %s1576_s12 = int_to_ptr.vmem [resolvable:$true] %s1575_s12 }
 0x28d   :  { %1469 = vmatpush.msra.mxu3 %v1285_v31  ;;  %1580 = dma.vmem_to_hbm [thread:$0]  %s1576_s12, 32, %s1578_s26, [#allocation3]  }
 0x28f   :  { %1470 = vmatpush.msra.mxu3 %v1284_v26 }
 0x291   :  { %1471 = vmatpush.msra.mxu3 %v1283_v32 }
 0x293   :  { %1472 = vmatpush.msra.mxu3 %v1282_v5 }
 0x30f   :  { %v1361_v12 = vpop.f32.mrf.mxu3 }
 0x310   :  { %v1362_v36 = vadd.f32 %v1746_v61, %v1361_v12 }
 0x312   :  { %1755 = vtanh.f32 %v1362_v36 }
 0x317   :  { %v1363_v52 = vpop.f32.mrf.mxu3 }
 0x318   :  { %v1364_v15 = vadd.f32 %v1746_v61, %v1363_v52  ;;  %v1756_v37 = vpop.eup %1755 }
 0x31a   :  { %1757 = vtanh.f32 %v1364_v15 }
 0x320   :  { %v1758_v63 = vpop.eup %1757 }
 0x321   :  { %v1368_v49 = vpack.c.bf16 %v1758_v63, %v1756_v37 }
 0x323   :  { %1704 = vmatmul.msk.bf16.vlgmr.msrb.gmra.mxu2 %vm923_vm3, %v1368_v49 }
 0x3a6   :  { %v1403_v50 = vpop.f32.mrf.mxu2 }
 0x3a7   :  { %v1404_v55 = vadd.f32 %v1747_v1, %v1403_v50 }
 0x3a9   :  { %1759 = vtanh.f32 %v1404_v55 }
 0x3ae   :  { %v1405_v57 = vpop.f32.mrf.mxu2 }
 0x3af   :  { %v1760_v43 = vpop.eup %1759  ;;  %v1406_v19 = vadd.f32 %v1747_v1, %v1405_v57 }
 0x3b0   :  { %v1410_v30 = vsel %vm923_vm3, %v1760_v43, 0.0 }
 0x3b1   :  { %v1411_v27 = vrot.slane %v1410_v30, 4  ;;  %1761 = vtanh.f32 %v1406_v19 }
 0x3b3   :  { %v1412_v16 = vadd.f32 %v1411_v27, %v1410_v30 }
 0x3b5   :  { %v1413_v0 = vrot.slane %v1412_v16, 2 }
 0x3b7   :  { %v1762_v33 = vpop.eup %1761  ;;  %v1414_v54 = vadd.f32 %v1413_v0, %v1412_v16 }
 0x3b8   :  { %v1417_v58 = vsel %vm923_vm3, %v1762_v33, 0.0  ;;  %v1477_v53 = vpack.c.bf16 %v1762_v33, %v1760_v43 }
 0x3b9   :  { %v1418_v48 = vrot.slane %v1417_v58, 4  ;;  %v1415_v3 = vrot.slane %v1414_v54, 1 }
 0x3ba   :  { %1724 = vmatmul.msk.bf16.vlgmr.msra.gmra.mxu2 %vm923_vm3, %v1477_v53 }
 0x3bb   :  { %v1419_v2 = vadd.f32 %v1418_v48, %v1417_v58  ;;  %v1416_v24 = vadd.f32 %v1415_v3, %v1414_v54 }
 0x3bd   :  { %v1420_v51 = vrot.slane %v1419_v2, 2 }
 0x3bf   :  { %v1421_v22 = vadd.f32 %v1420_v51, %v1419_v2 }
 0x3c1   :  { %v1422_v4 = vrot.slane %v1421_v22, 1 }
 0x3c3   :  { %v1423_v38 = vadd.f32 %v1422_v4, %v1421_v22 }
 0x3c5   :  { %v1424_v56 = vsel %vm346_vm0, %v1416_v24, %v1423_v38 }
 0x3c6   :  { %v1425_v17 = vmul.f32 0.125, %v1424_v56 }
 0x3c8   :  { %1709 = vmatmul.msk.f32.vlgmr.msrb.gmra.mxu3 %vm923_vm3, %v1425_v17 }
 0x3c9   :  { %1555 = vmatpush.msrb.mxu3 %v1728_v45 }
 0x3cb   :  { %1556 = vmatpush.msrb.mxu3 %v1727_v13 }
 0x3cd   :  { %1557 = vmatpush.msrb.mxu3 %v1726_v6 }
 0x3cf   :  { %1558 = vmatpush.msrb.mxu3 %v1725_v7 }
 0x3d0   :  { %1710 = vmatmul.msk.f32.vlgmr.msra.gmra.mxu3 %vm923_vm3, %v1281_v35 }
 0x43d   :  { %v1512_v14 = vpop.f32.mrf.mxu2 }
 0x43e   :  { %v1513_v12 = vadd.f32 %v1748_v42, %v1512_v14 }
 0x440   :  { %1763 = vtanh.f32 %v1513_v12 }
 0x445   :  { %v1514_v61 = vpop.f32.mrf.mxu2 }
 0x446   :  { %v1764_v36 = vpop.eup %1763  ;;  %v1515_v52 = vadd.f32 %v1748_v42, %v1514_v61 }
 0x447   :  { %v1519_v15 = vsel %vm923_vm3, %v1764_v36, 0.0 }
 0x448   :  { %v1520_v37 = vrot.slane %v1519_v15, 4  ;;  %1765 = vtanh.f32 %v1515_v52 }
 0x44a   :  { %v1521_v63 = vadd.f32 %v1520_v37, %v1519_v15 }
 0x44b   :  { %v1451_v11 = vpop.f32.mrf.mxu3 }
 0x44c   :  { %v1522_v28 = vrot.slane %v1521_v63, 2 }
 0x44e   :  { %v1766_v49 = vpop.eup %1765  ;;  %v1523_v40 = vadd.f32 %v1522_v28, %v1521_v63 }
 0x44f   :  { %v1526_v21 = vsel %vm923_vm3, %v1766_v49, 0.0 }
 0x450   :  { %v1527_v62 = vrot.slane %v1526_v21, 4  ;;  %v1524_v47 = vrot.slane %v1523_v40, 1 }
 0x452   :  { %v1528_v10 = vadd.f32 %v1527_v62, %v1526_v21  ;;  %v1525_v18 = vadd.f32 %v1524_v47, %v1523_v40 }
 0x453   :  { %v1474_v39 = vpop.f32.mrf.mxu3 }
 0x454   :  { %v1529_v25 = vrot.slane %v1528_v10, 2  ;;  %v1475_v9 = vadd.f32 %v1474_v39, %v1451_v11 }
 0x456   :  { %v1530_v23 = vadd.f32 %v1529_v25, %v1528_v10 }
 0x458   :  { %v1531_v41 = vrot.slane %v1530_v23, 1 }
 0x45a   :  { %v1532_v8 = vadd.f32 %v1531_v41, %v1530_v23 }
 0x45c   :  { %v1533_v34 = vsel %vm346_vm0, %v1525_v18, %v1532_v8 }
 0x45d   :  { %v1534_v1 = vmul.f32 0.125, %v1533_v34 }
 0x45f   :  { %1729 = vmatmul.msk.f32.vlgmr.msrb.gmra.mxu3 %vm923_vm3, %v1534_v1 }
 0x4e2   :  { %v1560_v50 = vpop.f32.mrf.mxu3 }
 0x4e3   :  { %v1563_v55 = vadd.f32 %v1560_v50, %v1475_v9 }
 0x4e5   :  { %v1568_v31 = vadd.f32 %v1749_v44, %v1563_v55 }
 0x4e7   :  { %1569 = vst [vmem:[#allocation4] sm:$0x3] %v1568_v31 }
 0x4e8   :  { %1591 = dma.vmem_to_hbm [thread:$0]  %s1587_s2, 32, %s1589_s29, [#allocation5]  }
 0x4e9   :  { %1817 = dma.done.wait [#allocation3], 32  }
 0x4ea   :  { %1818 = vsyncadd [#allocation3], 4294967264 }
 0x4eb   :  { %1819 = dma.done.wait [#allocation5], 32  }
 0x4ec   :  { %1820 = vsyncadd [#allocation5], 4294967264 }
 0x4ed   :  { %1600 = vsyncpa [#allocation3], 1 }
 0x4ee   :  { %1601 = vsyncpa [#allocation5], 1 }

</bundles_post_ra>
